<compile_context>
chip_gen: v7x
topology: tpu7x:2x2x1
jax: 0.10.0
libtpu: 0.0.40
codegen_flags: <defaults>
</compile_context>

<pallas_src>
import math
import functools

import jax
import jax.numpy as jnp
from jax.experimental import pallas as pl
from jax.experimental.pallas import tpu as pltpu


# ----------------------------- window helpers ------------------------------ #

def _gaussian_1d(window_size, sigma):
    vals = [math.exp(-((x - window_size // 2) ** 2) / float(2 * sigma ** 2))
            for x in range(window_size)]
    g = jnp.asarray(vals, dtype=jnp.float32)
    return g / jnp.sum(g)


def _band_matrix(n, g, pad):
    # M[i, j] = g[j - i + pad] (0 outside the window) so that
    # (M @ x)[i, :] = sum_k g[k] * x_zero_padded[i + k, :]
    # == 1-D correlation with zero padding `pad`, exactly like F.conv2d.
    ws = g.shape[0]
    i = jnp.arange(n)[:, None]
    j = jnp.arange(n)[None, :]
    k = j - i + pad
    valid = (k >= 0) & (k < ws)
    kc = jnp.clip(k, 0, ws - 1)
    return jnp.where(valid, g[kc], 0.0).astype(jnp.float32)


# ------------------------------- kernels ----------------------------------- #

def _plane_one_minus_ssim(A, B, x1, x2, c1, c2):
    """(1 - ssim_map) for one (H, W) plane; all matmuls hit the MXU."""
    def conv(x):
        t = jnp.dot(A, x, preferred_element_type=jnp.float32)   # conv along H
        return jnp.dot(t, B, preferred_element_type=jnp.float32)  # conv along W

    mu1 = conv(x1)
    mu2 = conv(x2)
    mu1_sq = mu1 * mu1
    mu2_sq = mu2 * mu2
    mu1_mu2 = mu1 * mu2
    sigma1_sq = conv(x1 * x1) - mu1_sq
    sigma2_sq = conv(x2 * x2) - mu2_sq
    sigma12 = conv(x1 * x2) - mu1_mu2
    v1 = 2.0 * sigma12 + c2
    v2 = sigma1_sq + sigma2_sq + c2
    ssim_map = (2.0 * mu1_mu2 + c1) * v1 / ((mu1_sq + mu2_sq + c1) * v2)
    return 1.0 - ssim_map


def _ssim_map_kernel(a_ref, b_ref, x1_ref, x2_ref, o_ref, *, c1, c2, planes):
    A = a_ref[...]
    B = b_ref[...]
    for p in range(planes):
        o_ref[p] = _plane_one_minus_ssim(A, B, x1_ref[p], x2_ref[p],
                                         c1, c2).astype(o_ref.dtype)


def _ssim_sum_kernel(a_ref, b_ref, x1_ref, x2_ref, o_ref, *, c1, c2, planes):
    # Per-block partial sum of (1 - ssim_map); keeps the grid "parallel" so
    # v7x's two TensorCores both run (no serial (1,1) accumulator).
    A = a_ref[...]
    B = b_ref[...]
    s = jnp.float32(0.0)
    for p in range(planes):
        s = s + jnp.sum(_plane_one_minus_ssim(A, B, x1_ref[p], x2_ref[p],
                                              c1, c2))
    o_ref[...] = jnp.zeros((1, 8, 128), jnp.float32) + s


# ------------------------------- wrapper ------------------------------------ #

def ssim_forward(img1, img2, size_average=False, max_val=255.0,
                 max_block_bytes=512 * 1024, max_planes_per_block=8):
    """Pallas implementation of SSIM.forward (returns 1 - ssim)."""
    assert img1.shape == img2.shape, "SSIM expects identically shaped inputs"
    n, c, h, w = img1.shape
    window_size = min(h, w, 11)
    # TODO(synk): even window sizes (min(H, W) < 11 and even) change the conv
    # output spatial size in the PyTorch module; only the odd case is handled.
    assert window_size % 2 == 1, "only odd Gaussian window sizes are supported"
    sigma = 1.5 * window_size / 11.0
    pad = window_size // 2

    g = _gaussian_1d(window_size, sigma)
    A = _band_matrix(h, g, pad)        # conv along H:  A @ x
    B = _band_matrix(w, g, pad).T      # conv along W:  x @ B

    c1 = float((0.01 * max_val) ** 2)
    c2 = float((0.03 * max_val) ** 2)

    x1 = img1.astype(jnp.float32).reshape(n * c, h, w)   # free reshape, no pad
    x2 = img2.astype(jnp.float32).reshape(n * c, h, w)
    total_planes = n * c

    # Several whole planes per block (divisor of N*C), capped so blocks stay
    # well inside v5e's 16 MiB scoped-VMEM default (and v7x's 64 MiB VMEM).
    plane_bytes = h * w * 4
    cap = max(1, min(max_planes_per_block, max_block_bytes // plane_bytes))
    planes_per_block = 1
    for p in range(1, min(cap, total_planes) + 1):
        if total_planes % p == 0:
            planes_per_block = p
    num_blocks = total_planes // planes_per_block
    # TODO(synk): for very large H*W planes, add spatial tiling with ws//2
    # halos instead of whole-plane blocks.

    in_specs = [
        pl.BlockSpec((h, h), lambda i: (0, 0)),
        pl.BlockSpec((w, w), lambda i: (0, 0)),
        pl.BlockSpec((planes_per_block, h, w), lambda i: (i, 0, 0)),
        pl.BlockSpec((planes_per_block, h, w), lambda i: (i, 0, 0)),
    ]
    compiler_params = pltpu.CompilerParams(dimension_semantics=("parallel",))

    if not size_average:
        kernel = functools.partial(_ssim_map_kernel, c1=c1, c2=c2,
                                   planes=planes_per_block)
        out = pl.pallas_call(
            kernel,
            out_shape=jax.ShapeDtypeStruct((total_planes, h, w), jnp.float32),
            grid_spec=pltpu.PrefetchScalarGridSpec(
                num_scalar_prefetch=0,
                grid=(num_blocks,),
                in_specs=in_specs,
                out_specs=pl.BlockSpec((planes_per_block, h, w),
                                       lambda i: (i, 0, 0)),
            ),
            compiler_params=compiler_params,
        )(A, B, x1, x2)
        return out.reshape(n, c, h, w)

    kernel = functools.partial(_ssim_sum_kernel, c1=c1, c2=c2,
                               planes=planes_per_block)
    partial_sums = pl.pallas_call(
        kernel,
        out_shape=jax.ShapeDtypeStruct((num_blocks, 8, 128), jnp.float32),
        grid_spec=pltpu.PrefetchScalarGridSpec(
            num_scalar_prefetch=0,
            grid=(num_blocks,),
            in_specs=in_specs,
            out_specs=pl.BlockSpec((1, 8, 128), lambda i: (i, 0, 0)),
        ),
        compiler_params=compiler_params,
    )(A, B, x1, x2)
    total = jnp.sum(partial_sums[:, 0, 0])
    return total / jnp.float32(total_planes * h * w)


# ------------------------------ reference ----------------------------------- #

def _ssim_reference(img1, img2, size_average=False, max_val=255.0):
    """Pure-JAX reference using a real depthwise conv (independent path)."""
    n, c, h, w = img1.shape
    ws = min(h, w, 11)
    sigma = 1.5 * ws / 11.0
    pad = ws // 2
    g = _gaussian_1d(ws, sigma)
    window = jnp.outer(g, g)
    kernel = jnp.broadcast_to(window[None, None], (c, 1, ws, ws))

    def conv(x):
        return jax.lax.conv_general_dilated(
            x.astype(jnp.float32), kernel,
            window_strides=(1, 1),
            padding=[(pad, pad), (pad, pad)],
            dimension_numbers=("NCHW", "OIHW", "NCHW"),
            feature_group_count=c,
            precision=jax.lax.Precision.HIGHEST)

    mu1 = conv(img1)
    mu2 = conv(img2)
    mu1_sq = mu1 * mu1
    mu2_sq = mu2 * mu2
    mu1_mu2 = mu1 * mu2
    sigma1_sq = conv(img1 * img1) - mu1_sq
    sigma2_sq = conv(img2 * img2) - mu2_sq
    sigma12 = conv(img1 * img2) - mu1_mu2
    C1 = (0.01 * max_val) ** 2
    C2 = (0.03 * max_val) ** 2
    v1 = 2.0 * sigma12 + C2
    v2 = sigma1_sq + sigma2_sq + C2
    ssim_map = (2.0 * mu1_mu2 + C1) * v1 / ((mu1_sq + mu2_sq + C1) * v2)
    if size_average:
        return 1.0 - ssim_map.mean()
    return 1.0 - ssim_map


# -------------------------------- demo -------------------------------------- #

if __name__ == "__main__":
    key = jax.random.PRNGKey(0)
    k1, k2 = jax.random.split(key)
    # NCHW; channels=3 matches the module default (grouped conv needs C==channel).
    img1 = jax.random.normal(k1, (2, 3, 16, 16), dtype=jnp.float32)
    img2 = jax.random.normal(k2, (2, 3, 16, 16), dtype=jnp.float32)

    # Default path: size_average=False -> full (1 - ssim_map), NCHW.
    out_map = ssim_forward(img1, img2, size_average=False)
    out_map = jax.block_until_ready(out_map)

    # size_average=True path: scalar 1 - ssim_map.mean().
    out_mean = ssim_forward(img1, img2, size_average=True)
    out_mean = jax.block_until_ready(out_mean)

    ref_map = _ssim_reference(img1, img2, size_average=False)
    ref_mean = _ssim_reference(img1, img2, size_average=True)

    assert out_map.shape == img1.shape
    assert jnp.allclose(out_map, ref_map, atol=2e-3, rtol=2e-3)
    assert jnp.allclose(out_mean, ref_mean, atol=2e-3, rtol=2e-3)

    print("KERNEL_OK")
</pallas_src>

<mosaic_0001>
module attributes {stable_mosaic.version = 11 : i64} {
  func.func @_ssim_map_kernel(%arg0: i32, %arg1: memref<16x16xf32, #tpu.memory_space<vmem>>, %arg2: memref<16x16xf32, #tpu.memory_space<vmem>>, %arg3: memref<6x16x16xf32, #tpu.memory_space<vmem>>, %arg4: memref<6x16x16xf32, #tpu.memory_space<vmem>>, %arg5: memref<6x16x16xf32, #tpu.memory_space<vmem>>) attributes {dimension_semantics = [#tpu.dimension_semantics<parallel>], iteration_bounds = array<i64: 1>, scalar_prefetch = 0 : i64, scratch_operands = 0 : i64, tpu.core_type = #tpu.core_type<tc>, window_params = [{pipeline_mode = #tpu.pipeline_mode<synchronous>, transform_indices = @transform_0, window_bounds = array<i64: 16, 16>}, {pipeline_mode = #tpu.pipeline_mode<synchronous>, transform_indices = @transform_1, window_bounds = array<i64: 16, 16>}, {transform_indices = @transform_2, window_bounds = array<i64: 6, 16, 16>}, {transform_indices = @transform_3, window_bounds = array<i64: 6, 16, 16>}, {transform_indices = @transform_4, window_bounds = array<i64: 6, 16, 16>}]} {
    %c0 = arith.constant 0 : index
    %c0_0 = arith.constant 0 : index
    %0 = vector.load %arg1[%c0, %c0_0] : memref<16x16xf32, #tpu.memory_space<vmem>>, vector<16x16xf32>
    %c0_1 = arith.constant 0 : index
    %c0_2 = arith.constant 0 : index
    %1 = vector.load %arg2[%c0_1, %c0_2] : memref<16x16xf32, #tpu.memory_space<vmem>>, vector<16x16xf32>
    %c0_3 = arith.constant 0 : index
    %c0_4 = arith.constant 0 : index
    %c0_5 = arith.constant 0 : index
    %2 = vector.load %arg3[%c0_3, %c0_4, %c0_5] : memref<6x16x16xf32, #tpu.memory_space<vmem>>, vector<1x16x16xf32>
    %3 = vector.shape_cast %2 : vector<1x16x16xf32> to vector<16x16xf32>
    %c0_6 = arith.constant 0 : index
    %c0_7 = arith.constant 0 : index
    %c0_8 = arith.constant 0 : index
    %4 = vector.load %arg4[%c0_6, %c0_7, %c0_8] : memref<6x16x16xf32, #tpu.memory_space<vmem>>, vector<1x16x16xf32>
    %5 = vector.shape_cast %4 : vector<1x16x16xf32> to vector<16x16xf32>
    %cst = arith.constant dense<0.000000e+00> : vector<16x16xf32>
    %6 = tpu.matmul %0, %3, %cst {dimension_numbers = #tpu.dot_dimension_numbers<[1], [0], [0], [1], [0, 0, 1, 1], [], []>} : vector<16x16xf32>, vector<16x16xf32>, vector<16x16xf32> -> vector<16x16xf32>
    %cst_9 = arith.constant dense<0.000000e+00> : vector<16x16xf32>
    %7 = tpu.matmul %6, %1, %cst_9 {dimension_numbers = #tpu.dot_dimension_numbers<[1], [0], [0], [1], [0, 0, 1, 1], [], []>} : vector<16x16xf32>, vector<16x16xf32>, vector<16x16xf32> -> vector<16x16xf32>
    %cst_10 = arith.constant dense<0.000000e+00> : vector<16x16xf32>
    %8 = tpu.matmul %0, %5, %cst_10 {dimension_numbers = #tpu.dot_dimension_numbers<[1], [0], [0], [1], [0, 0, 1, 1], [], []>} : vector<16x16xf32>, vector<16x16xf32>, vector<16x16xf32> -> vector<16x16xf32>
    %cst_11 = arith.constant dense<0.000000e+00> : vector<16x16xf32>
    %9 = tpu.matmul %8, %1, %cst_11 {dimension_numbers = #tpu.dot_dimension_numbers<[1], [0], [0], [1], [0, 0, 1, 1], [], []>} : vector<16x16xf32>, vector<16x16xf32>, vector<16x16xf32> -> vector<16x16xf32>
    %10 = arith.mulf %7, %7 : vector<16x16xf32>
    %11 = arith.mulf %9, %9 : vector<16x16xf32>
    %12 = arith.mulf %7, %9 : vector<16x16xf32>
    %13 = arith.mulf %3, %3 : vector<16x16xf32>
    %cst_12 = arith.constant dense<0.000000e+00> : vector<16x16xf32>
    %14 = tpu.matmul %0, %13, %cst_12 {dimension_numbers = #tpu.dot_dimension_numbers<[1], [0], [0], [1], [0, 0, 1, 1], [], []>} : vector<16x16xf32>, vector<16x16xf32>, vector<16x16xf32> -> vector<16x16xf32>
    %cst_13 = arith.constant dense<0.000000e+00> : vector<16x16xf32>
    %15 = tpu.matmul %14, %1, %cst_13 {dimension_numbers = #tpu.dot_dimension_numbers<[1], [0], [0], [1], [0, 0, 1, 1], [], []>} : vector<16x16xf32>, vector<16x16xf32>, vector<16x16xf32> -> vector<16x16xf32>
    %16 = arith.subf %15, %10 : vector<16x16xf32>
    %17 = arith.mulf %5, %5 : vector<16x16xf32>
    %cst_14 = arith.constant dense<0.000000e+00> : vector<16x16xf32>
    %18 = tpu.matmul %0, %17, %cst_14 {dimension_numbers = #tpu.dot_dimension_numbers<[1], [0], [0], [1], [0, 0, 1, 1], [], []>} : vector<16x16xf32>, vector<16x16xf32>, vector<16x16xf32> -> vector<16x16xf32>
    %cst_15 = arith.constant dense<0.000000e+00> : vector<16x16xf32>
    %19 = tpu.matmul %18, %1, %cst_15 {dimension_numbers = #tpu.dot_dimension_numbers<[1], [0], [0], [1], [0, 0, 1, 1], [], []>} : vector<16x16xf32>, vector<16x16xf32>, vector<16x16xf32> -> vector<16x16xf32>
    %20 = arith.subf %19, %11 : vector<16x16xf32>
    %21 = arith.mulf %3, %5 : vector<16x16xf32>
    %cst_16 = arith.constant dense<0.000000e+00> : vector<16x16xf32>
    %22 = tpu.matmul %0, %21, %cst_16 {dimension_numbers = #tpu.dot_dimension_numbers<[1], [0], [0], [1], [0, 0, 1, 1], [], []>} : vector<16x16xf32>, vector<16x16xf32>, vector<16x16xf32> -> vector<16x16xf32>
    %cst_17 = arith.constant dense<0.000000e+00> : vector<16x16xf32>
    %23 = tpu.matmul %22, %1, %cst_17 {dimension_numbers = #tpu.dot_dimension_numbers<[1], [0], [0], [1], [0, 0, 1, 1], [], []>} : vector<16x16xf32>, vector<16x16xf32>, vector<16x16xf32> -> vector<16x16xf32>
    %24 = arith.subf %23, %12 : vector<16x16xf32>
    %cst_18 = arith.constant 2.000000e+00 : f32
    %25 = vector.broadcast %cst_18 : f32 to vector<16x16xf32>
    %26 = arith.mulf %25, %24 : vector<16x16xf32>
    %cst_19 = arith.constant 5.852250e+01 : f32
    %27 = vector.broadcast %cst_19 : f32 to vector<16x16xf32>
    %28 = arith.addf %26, %27 : vector<16x16xf32>
    %29 = arith.addf %16, %20 : vector<16x16xf32>
    %cst_20 = arith.constant 5.852250e+01 : f32
    %30 = vector.broadcast %cst_20 : f32 to vector<16x16xf32>
    %31 = arith.addf %29, %30 : vector<16x16xf32>
    %cst_21 = arith.constant 2.000000e+00 : f32
    %32 = vector.broadcast %cst_21 : f32 to vector<16x16xf32>
    %33 = arith.mulf %32, %12 : vector<16x16xf32>
    %cst_22 = arith.constant 6.502500e+00 : f32
    %34 = vector.broadcast %cst_22 : f32 to vector<16x16xf32>
    %35 = arith.addf %33, %34 : vector<16x16xf32>
    %36 = arith.mulf %35, %28 : vector<16x16xf32>
    %37 = arith.addf %10, %11 : vector<16x16xf32>
    %cst_23 = arith.constant 6.502500e+00 : f32
    %38 = vector.broadcast %cst_23 : f32 to vector<16x16xf32>
    %39 = arith.addf %37, %38 : vector<16x16xf32>
    %40 = arith.mulf %39, %31 : vector<16x16xf32>
    %41 = arith.divf %36, %40 : vector<16x16xf32>
    %cst_24 = arith.constant 1.000000e+00 : f32
    %42 = vector.broadcast %cst_24 : f32 to vector<16x16xf32>
    %43 = arith.subf %42, %41 : vector<16x16xf32>
    %c0_25 = arith.constant 0 : index
    %c0_26 = arith.constant 0 : index
    %c0_27 = arith.constant 0 : index
    %44 = vector.load %arg5[%c0_25, %c0_26, %c0_27] : memref<6x16x16xf32, #tpu.memory_space<vmem>>, vector<1x16x16xf32>
    %45 = vector.shape_cast %44 : vector<1x16x16xf32> to vector<16x16xf32>
    %46 = vector.shape_cast %43 : vector<16x16xf32> to vector<1x16x16xf32>
    tpu.vector_store %arg5[%c0_25, %c0_26, %c0_27], %46 {strides = array<i32>} : memref<6x16x16xf32, #tpu.memory_space<vmem>>, vector<1x16x16xf32>,
    %c1 = arith.constant 1 : index
    %c0_28 = arith.constant 0 : index
    %c0_29 = arith.constant 0 : index
    %47 = vector.load %arg3[%c1, %c0_28, %c0_29] : memref<6x16x16xf32, #tpu.memory_space<vmem>>, vector<1x16x16xf32>
    %48 = vector.shape_cast %47 : vector<1x16x16xf32> to vector<16x16xf32>
    %c1_30 = arith.constant 1 : index
    %c0_31 = arith.constant 0 : index
    %c0_32 = arith.constant 0 : index
    %49 = vector.load %arg4[%c1_30, %c0_31, %c0_32] : memref<6x16x16xf32, #tpu.memory_space<vmem>>, vector<1x16x16xf32>
    %50 = vector.shape_cast %49 : vector<1x16x16xf32> to vector<16x16xf32>
    %cst_33 = arith.constant dense<0.000000e+00> : vector<16x16xf32>
    %51 = tpu.matmul %0, %48, %cst_33 {dimension_numbers = #tpu.dot_dimension_numbers<[1], [0], [0], [1], [0, 0, 1, 1], [], []>} : vector<16x16xf32>, vector<16x16xf32>, vector<16x16xf32> -> vector<16x16xf32>
    %cst_34 = arith.constant dense<0.000000e+00> : vector<16x16xf32>
    %52 = tpu.matmul %51, %1, %cst_34 {dimension_numbers = #tpu.dot_dimension_numbers<[1], [0], [0], [1], [0, 0, 1, 1], [], []>} : vector<16x16xf32>, vector<16x16xf32>, vector<16x16xf32> -> vector<16x16xf32>
    %cst_35 = arith.constant dense<0.000000e+00> : vector<16x16xf32>
    %53 = tpu.matmul %0, %50, %cst_35 {dimension_numbers = #tpu.dot_dimension_numbers<[1], [0], [0], [1], [0, 0, 1, 1], [], []>} : vector<16x16xf32>, vector<16x16xf32>, vector<16x16xf32> -> vector<16x16xf32>
    %cst_36 = arith.constant dense<0.000000e+00> : vector<16x16xf32>
    %54 = tpu.matmul %53, %1, %cst_36 {dimension_numbers = #tpu.dot_dimension_numbers<[1], [0], [0], [1], [0, 0, 1, 1], [], []>} : vector<16x16xf32>, vector<16x16xf32>, vector<16x16xf32> -> vector<16x16xf32>
    %55 = arith.mulf %52, %52 : vector<16x16xf32>
    %56 = arith.mulf %54, %54 : vector<16x16xf32>
    %57 = arith.mulf %52, %54 : vector<16x16xf32>
    %58 = arith.mulf %48, %48 : vector<16x16xf32>
    %cst_37 = arith.constant dense<0.000000e+00> : vector<16x16xf32>
    %59 = tpu.matmul %0, %58, %cst_37 {dimension_numbers = #tpu.dot_dimension_numbers<[1], [0], [0], [1], [0, 0, 1, 1], [], []>} : vector<16x16xf32>, vector<16x16xf32>, vector<16x16xf32> -> vector<16x16xf32>
    %cst_38 = arith.constant dense<0.000000e+00> : vector<16x16xf32>
    %60 = tpu.matmul %59, %1, %cst_38 {dimension_numbers = #tpu.dot_dimension_numbers<[1], [0], [0], [1], [0, 0, 1, 1], [], []>} : vector<16x16xf32>, vector<16x16xf32>, vector<16x16xf32> -> vector<16x16xf32>
    %61 = arith.subf %60, %55 : vector<16x16xf32>
    %62 = arith.mulf %50, %50 : vector<16x16xf32>
    %cst_39 = arith.constant dense<0.000000e+00> : vector<16x16xf32>
    %63 = tpu.matmul %0, %62, %cst_39 {dimension_numbers = #tpu.dot_dimension_numbers<[1], [0], [0], [1], [0, 0, 1, 1], [], []>} : vector<16x16xf32>, vector<16x16xf32>, vector<16x16xf32> -> vector<16x16xf32>
    %cst_40 = arith.constant dense<0.000000e+00> : vector<16x16xf32>
    %64 = tpu.matmul %63, %1, %cst_40 {dimension_numbers = #tpu.dot_dimension_numbers<[1], [0], [0], [1], [0, 0, 1, 1], [], []>} : vector<16x16xf32>, vector<16x16xf32>, vector<16x16xf32> -> vector<16x16xf32>
    %65 = arith.subf %64, %56 : vector<16x16xf32>
    %66 = arith.mulf %48, %50 : vector<16x16xf32>
    %cst_41 = arith.constant dense<0.000000e+00> : vector<16x16xf32>
    %67 = tpu.matmul %0, %66, %cst_41 {dimension_numbers = #tpu.dot_dimension_numbers<[1], [0], [0], [1], [0, 0, 1, 1], [], []>} : vector<16x16xf32>, vector<16x16xf32>, vector<16x16xf32> -> vector<16x16xf32>
    %cst_42 = arith.constant dense<0.000000e+00> : vector<16x16xf32>
    %68 = tpu.matmul %67, %1, %cst_42 {dimension_numbers = #tpu.dot_dimension_numbers<[1], [0], [0], [1], [0, 0, 1, 1], [], []>} : vector<16x16xf32>, vector<16x16xf32>, vector<16x16xf32> -> vector<16x16xf32>
    %69 = arith.subf %68, %57 : vector<16x16xf32>
    %cst_43 = arith.constant 2.000000e+00 : f32
    %70 = vector.broadcast %cst_43 : f32 to vector<16x16xf32>
    %71 = arith.mulf %70, %69 : vector<16x16xf32>
    %cst_44 = arith.constant 5.852250e+01 : f32
    %72 = vector.broadcast %cst_44 : f32 to vector<16x16xf32>
    %73 = arith.addf %71, %72 : vector<16x16xf32>
    %74 = arith.addf %61, %65 : vector<16x16xf32>
    %cst_45 = arith.constant 5.852250e+01 : f32
    %75 = vector.broadcast %cst_45 : f32 to vector<16x16xf32>
    %76 = arith.addf %74, %75 : vector<16x16xf32>
    %cst_46 = arith.constant 2.000000e+00 : f32
    %77 = vector.broadcast %cst_46 : f32 to vector<16x16xf32>
    %78 = arith.mulf %77, %57 : vector<16x16xf32>
    %cst_47 = arith.constant 6.502500e+00 : f32
    %79 = vector.broadcast %cst_47 : f32 to vector<16x16xf32>
    %80 = arith.addf %78, %79 : vector<16x16xf32>
    %81 = arith.mulf %80, %73 : vector<16x16xf32>
    %82 = arith.addf %55, %56 : vector<16x16xf32>
    %cst_48 = arith.constant 6.502500e+00 : f32
    %83 = vector.broadcast %cst_48 : f32 to vector<16x16xf32>
    %84 = arith.addf %82, %83 : vector<16x16xf32>
    %85 = arith.mulf %84, %76 : vector<16x16xf32>
    %86 = arith.divf %81, %85 : vector<16x16xf32>
    %cst_49 = arith.constant 1.000000e+00 : f32
    %87 = vector.broadcast %cst_49 : f32 to vector<16x16xf32>
    %88 = arith.subf %87, %86 : vector<16x16xf32>
    %c1_50 = arith.constant 1 : index
    %c0_51 = arith.constant 0 : index
    %c0_52 = arith.constant 0 : index
    %89 = vector.load %arg5[%c1_50, %c0_51, %c0_52] : memref<6x16x16xf32, #tpu.memory_space<vmem>>, vector<1x16x16xf32>
    %90 = vector.shape_cast %89 : vector<1x16x16xf32> to vector<16x16xf32>
    %91 = vector.shape_cast %88 : vector<16x16xf32> to vector<1x16x16xf32>
    tpu.vector_store %arg5[%c1_50, %c0_51, %c0_52], %91 {strides = array<i32>} : memref<6x16x16xf32, #tpu.memory_space<vmem>>, vector<1x16x16xf32>,
    %c2 = arith.constant 2 : index
    %c0_53 = arith.constant 0 : index
    %c0_54 = arith.constant 0 : index
    %92 = vector.load %arg3[%c2, %c0_53, %c0_54] : memref<6x16x16xf32, #tpu.memory_space<vmem>>, vector<1x16x16xf32>
    %93 = vector.shape_cast %92 : vector<1x16x16xf32> to vector<16x16xf32>
    %c2_55 = arith.constant 2 : index
    %c0_56 = arith.constant 0 : index
    %c0_57 = arith.constant 0 : index
    %94 = vector.load %arg4[%c2_55, %c0_56, %c0_57] : memref<6x16x16xf32, #tpu.memory_space<vmem>>, vector<1x16x16xf32>
    %95 = vector.shape_cast %94 : vector<1x16x16xf32> to vector<16x16xf32>
    %cst_58 = arith.constant dense<0.000000e+00> : vector<16x16xf32>
    %96 = tpu.matmul %0, %93, %cst_58 {dimension_numbers = #tpu.dot_dimension_numbers<[1], [0], [0], [1], [0, 0, 1, 1], [], []>} : vector<16x16xf32>, vector<16x16xf32>, vector<16x16xf32> -> vector<16x16xf32>
    %cst_59 = arith.constant dense<0.000000e+00> : vector<16x16xf32>
    %97 = tpu.matmul %96, %1, %cst_59 {dimension_numbers = #tpu.dot_dimension_numbers<[1], [0], [0], [1], [0, 0, 1, 1], [], []>} : vector<16x16xf32>, vector<16x16xf32>, vector<16x16xf32> -> vector<16x16xf32>
    %cst_60 = arith.constant dense<0.000000e+00> : vector<16x16xf32>
    %98 = tpu.matmul %0, %95, %cst_60 {dimension_numbers = #tpu.dot_dimension_numbers<[1], [0], [0], [1], [0, 0, 1, 1], [], []>} : vector<16x16xf32>, vector<16x16xf32>, vector<16x16xf32> -> vector<16x16xf32>
    %cst_61 = arith.constant dense<0.000000e+00> : vector<16x16xf32>
    %99 = tpu.matmul %98, %1, %cst_61 {dimension_numbers = #tpu.dot_dimension_numbers<[1], [0], [0], [1], [0, 0, 1, 1], [], []>} : vector<16x16xf32>, vector<16x16xf32>, vector<16x16xf32> -> vector<16x16xf32>
    %100 = arith.mulf %97, %97 : vector<16x16xf32>
    %101 = arith.mulf %99, %99 : vector<16x16xf32>
    %102 = arith.mulf %97, %99 : vector<16x16xf32>
    %103 = arith.mulf %93, %93 : vector<16x16xf32>
    %cst_62 = arith.constant dense<0.000000e+00> : vector<16x16xf32>
    %104 = tpu.matmul %0, %103, %cst_62 {dimension_numbers = #tpu.dot_dimension_numbers<[1], [0], [0], [1], [0, 0, 1, 1], [], []>} : vector<16x16xf32>, vector<16x16xf32>, vector<16x16xf32> -> vector<16x16xf32>
    %cst_63 = arith.constant dense<0.000000e+00> : vector<16x16xf32>
    %105 = tpu.matmul %104, %1, %cst_63 {dimension_numbers = #tpu.dot_dimension_numbers<[1], [0], [0], [1], [0, 0, 1, 1], [], []>} : vector<16x16xf32>, vector<16x16xf32>, vector<16x16xf32> -> vector<16x16xf32>
    %106 = arith.subf %105, %100 : vector<16x16xf32>
    %107 = arith.mulf %95, %95 : vector<16x16xf32>
    %cst_64 = arith.constant dense<0.000000e+00> : vector<16x16xf32>
    %108 = tpu.matmul %0, %107, %cst_64 {dimension_numbers = #tpu.dot_dimension_numbers<[1], [0], [0], [1], [0, 0, 1, 1], [], []>} : vector<16x16xf32>, vector<16x16xf32>, vector<16x16xf32> -> vector<16x16xf32>
    %cst_65 = arith.constant dense<0.000000e+00> : vector<16x16xf32>
    %109 = tpu.matmul %108, %1, %cst_65 {dimension_numbers = #tpu.dot_dimension_numbers<[1], [0], [0], [1], [0, 0, 1, 1], [], []>} : vector<16x16xf32>, vector<16x16xf32>, vector<16x16xf32> -> vector<16x16xf32>
    %110 = arith.subf %109, %101 : vector<16x16xf32>
    %111 = arith.mulf %93, %95 : vector<16x16xf32>
    %cst_66 = arith.constant dense<0.000000e+00> : vector<16x16xf32>
    %112 = tpu.matmul %0, %111, %cst_66 {dimension_numbers = #tpu.dot_dimension_numbers<[1], [0], [0], [1], [0, 0, 1, 1], [], []>} : vector<16x16xf32>, vector<16x16xf32>, vector<16x16xf32> -> vector<16x16xf32>
    %cst_67 = arith.constant dense<0.000000e+00> : vector<16x16xf32>
    %113 = tpu.matmul %112, %1, %cst_67 {dimension_numbers = #tpu.dot_dimension_numbers<[1], [0], [0], [1], [0, 0, 1, 1], [], []>} : vector<16x16xf32>, vector<16x16xf32>, vector<16x16xf32> -> vector<16x16xf32>
    %114 = arith.subf %113, %102 : vector<16x16xf32>
    %cst_68 = arith.constant 2.000000e+00 : f32
    %115 = vector.broadcast %cst_68 : f32 to vector<16x16xf32>
    %116 = arith.mulf %115, %114 : vector<16x16xf32>
    %cst_69 = arith.constant 5.852250e+01 : f32
    %117 = vector.broadcast %cst_69 : f32 to vector<16x16xf32>
    %118 = arith.addf %116, %117 : vector<16x16xf32>
    %119 = arith.addf %106, %110 : vector<16x16xf32>
    %cst_70 = arith.constant 5.852250e+01 : f32
    %120 = vector.broadcast %cst_70 : f32 to vector<16x16xf32>
    %121 = arith.addf %119, %120 : vector<16x16xf32>
    %cst_71 = arith.constant 2.000000e+00 : f32
    %122 = vector.broadcast %cst_71 : f32 to vector<16x16xf32>
    %123 = arith.mulf %122, %102 : vector<16x16xf32>
    %cst_72 = arith.constant 6.502500e+00 : f32
    %124 = vector.broadcast %cst_72 : f32 to vector<16x16xf32>
    %125 = arith.addf %123, %124 : vector<16x16xf32>
    %126 = arith.mulf %125, %118 : vector<16x16xf32>
    %127 = arith.addf %100, %101 : vector<16x16xf32>
    %cst_73 = arith.constant 6.502500e+00 : f32
    %128 = vector.broadcast %cst_73 : f32 to vector<16x16xf32>
    %129 = arith.addf %127, %128 : vector<16x16xf32>
    %130 = arith.mulf %129, %121 : vector<16x16xf32>
    %131 = arith.divf %126, %130 : vector<16x16xf32>
    %cst_74 = arith.constant 1.000000e+00 : f32
    %132 = vector.broadcast %cst_74 : f32 to vector<16x16xf32>
    %133 = arith.subf %132, %131 : vector<16x16xf32>
    %c2_75 = arith.constant 2 : index
    %c0_76 = arith.constant 0 : index
    %c0_77 = arith.constant 0 : index
    %134 = vector.load %arg5[%c2_75, %c0_76, %c0_77] : memref<6x16x16xf32, #tpu.memory_space<vmem>>, vector<1x16x16xf32>
    %135 = vector.shape_cast %134 : vector<1x16x16xf32> to vector<16x16xf32>
    %136 = vector.shape_cast %133 : vector<16x16xf32> to vector<1x16x16xf32>
    tpu.vector_store %arg5[%c2_75, %c0_76, %c0_77], %136 {strides = array<i32>} : memref<6x16x16xf32, #tpu.memory_space<vmem>>, vector<1x16x16xf32>,
    %c3 = arith.constant 3 : index
    %c0_78 = arith.constant 0 : index
    %c0_79 = arith.constant 0 : index
    %137 = vector.load %arg3[%c3, %c0_78, %c0_79] : memref<6x16x16xf32, #tpu.memory_space<vmem>>, vector<1x16x16xf32>
    %138 = vector.shape_cast %137 : vector<1x16x16xf32> to vector<16x16xf32>
    %c3_80 = arith.constant 3 : index
    %c0_81 = arith.constant 0 : index
    %c0_82 = arith.constant 0 : index
    %139 = vector.load %arg4[%c3_80, %c0_81, %c0_82] : memref<6x16x16xf32, #tpu.memory_space<vmem>>, vector<1x16x16xf32>
    %140 = vector.shape_cast %139 : vector<1x16x16xf32> to vector<16x16xf32>
    %cst_83 = arith.constant dense<0.000000e+00> : vector<16x16xf32>
    %141 = tpu.matmul %0, %138, %cst_83 {dimension_numbers = #tpu.dot_dimension_numbers<[1], [0], [0], [1], [0, 0, 1, 1], [], []>} : vector<16x16xf32>, vector<16x16xf32>, vector<16x16xf32> -> vector<16x16xf32>
    %cst_84 = arith.constant dense<0.000000e+00> : vector<16x16xf32>
    %142 = tpu.matmul %141, %1, %cst_84 {dimension_numbers = #tpu.dot_dimension_numbers<[1], [0], [0], [1], [0, 0, 1, 1], [], []>} : vector<16x16xf32>, vector<16x16xf32>, vector<16x16xf32> -> vector<16x16xf32>
    %cst_85 = arith.constant dense<0.000000e+00> : vector<16x16xf32>
    %143 = tpu.matmul %0, %140, %cst_85 {dimension_numbers = #tpu.dot_dimension_numbers<[1], [0], [0], [1], [0, 0, 1, 1], [], []>} : vector<16x16xf32>, vector<16x16xf32>, vector<16x16xf32> -> vector<16x16xf32>
    %cst_86 = arith.constant dense<0.000000e+00> : vector<16x16xf32>
    %144 = tpu.matmul %143, %1, %cst_86 {dimension_numbers = #tpu.dot_dimension_numbers<[1], [0], [0], [1], [0, 0, 1, 1], [], []>} : vector<16x16xf32>, vector<16x16xf32>, vector<16x16xf32> -> vector<16x16xf32>
    %145 = arith.mulf %142, %142 : vector<16x16xf32>
    %146 = arith.mulf %144, %144 : vector<16x16xf32>
    %147 = arith.mulf %142, %144 : vector<16x16xf32>
    %148 = arith.mulf %138, %138 : vector<16x16xf32>
    %cst_87 = arith.constant dense<0.000000e+00> : vector<16x16xf32>
    %149 = tpu.matmul %0, %148, %cst_87 {dimension_numbers = #tpu.dot_dimension_numbers<[1], [0], [0], [1], [0, 0, 1, 1], [], []>} : vector<16x16xf32>, vector<16x16xf32>, vector<16x16xf32> -> vector<16x16xf32>
    %cst_88 = arith.constant dense<0.000000e+00> : vector<16x16xf32>
    %150 = tpu.matmul %149, %1, %cst_88 {dimension_numbers = #tpu.dot_dimension_numbers<[1], [0], [0], [1], [0, 0, 1, 1], [], []>} : vector<16x16xf32>, vector<16x16xf32>, vector<16x16xf32> -> vector<16x16xf32>
    %151 = arith.subf %150, %145 : vector<16x16xf32>
    %152 = arith.mulf %140, %140 : vector<16x16xf32>
    %cst_89 = arith.constant dense<0.000000e+00> : vector<16x16xf32>
    %153 = tpu.matmul %0, %152, %cst_89 {dimension_numbers = #tpu.dot_dimension_numbers<[1], [0], [0], [1], [0, 0, 1, 1], [], []>} : vector<16x16xf32>, vector<16x16xf32>, vector<16x16xf32> -> vector<16x16xf32>
    %cst_90 = arith.constant dense<0.000000e+00> : vector<16x16xf32>
    %154 = tpu.matmul %153, %1, %cst_90 {dimension_numbers = #tpu.dot_dimension_numbers<[1], [0], [0], [1], [0, 0, 1, 1], [], []>} : vector<16x16xf32>, vector<16x16xf32>, vector<16x16xf32> -> vector<16x16xf32>
    %155 = arith.subf %154, %146 : vector<16x16xf32>
    %156 = arith.mulf %138, %140 : vector<16x16xf32>
    %cst_91 = arith.constant dense<0.000000e+00> : vector<16x16xf32>
    %157 = tpu.matmul %0, %156, %cst_91 {dimension_numbers = #tpu.dot_dimension_numbers<[1], [0], [0], [1], [0, 0, 1, 1], [], []>} : vector<16x16xf32>, vector<16x16xf32>, vector<16x16xf32> -> vector<16x16xf32>
    %cst_92 = arith.constant dense<0.000000e+00> : vector<16x16xf32>
    %158 = tpu.matmul %157, %1, %cst_92 {dimension_numbers = #tpu.dot_dimension_numbers<[1], [0], [0], [1], [0, 0, 1, 1], [], []>} : vector<16x16xf32>, vector<16x16xf32>, vector<16x16xf32> -> vector<16x16xf32>
    %159 = arith.subf %158, %147 : vector<16x16xf32>
    %cst_93 = arith.constant 2.000000e+00 : f32
    %160 = vector.broadcast %cst_93 : f32 to vector<16x16xf32>
    %161 = arith.mulf %160, %159 : vector<16x16xf32>
    %cst_94 = arith.constant 5.852250e+01 : f32
    %162 = vector.broadcast %cst_94 : f32 to vector<16x16xf32>
    %163 = arith.addf %161, %162 : vector<16x16xf32>
    %164 = arith.addf %151, %155 : vector<16x16xf32>
    %cst_95 = arith.constant 5.852250e+01 : f32
    %165 = vector.broadcast %cst_95 : f32 to vector<16x16xf32>
    %166 = arith.addf %164, %165 : vector<16x16xf32>
    %cst_96 = arith.constant 2.000000e+00 : f32
    %167 = vector.broadcast %cst_96 : f32 to vector<16x16xf32>
    %168 = arith.mulf %167, %147 : vector<16x16xf32>
    %cst_97 = arith.constant 6.502500e+00 : f32
    %169 = vector.broadcast %cst_97 : f32 to vector<16x16xf32>
    %170 = arith.addf %168, %169 : vector<16x16xf32>
    %171 = arith.mulf %170, %163 : vector<16x16xf32>
    %172 = arith.addf %145, %146 : vector<16x16xf32>
    %cst_98 = arith.constant 6.502500e+00 : f32
    %173 = vector.broadcast %cst_98 : f32 to vector<16x16xf32>
    %174 = arith.addf %172, %173 : vector<16x16xf32>
    %175 = arith.mulf %174, %166 : vector<16x16xf32>
    %176 = arith.divf %171, %175 : vector<16x16xf32>
    %cst_99 = arith.constant 1.000000e+00 : f32
    %177 = vector.broadcast %cst_99 : f32 to vector<16x16xf32>
    %178 = arith.subf %177, %176 : vector<16x16xf32>
    %c3_100 = arith.constant 3 : index
    %c0_101 = arith.constant 0 : index
    %c0_102 = arith.constant 0 : index
    %179 = vector.load %arg5[%c3_100, %c0_101, %c0_102] : memref<6x16x16xf32, #tpu.memory_space<vmem>>, vector<1x16x16xf32>
    %180 = vector.shape_cast %179 : vector<1x16x16xf32> to vector<16x16xf32>
    %181 = vector.shape_cast %178 : vector<16x16xf32> to vector<1x16x16xf32>
    tpu.vector_store %arg5[%c3_100, %c0_101, %c0_102], %181 {strides = array<i32>} : memref<6x16x16xf32, #tpu.memory_space<vmem>>, vector<1x16x16xf32>,
    %c4 = arith.constant 4 : index
    %c0_103 = arith.constant 0 : index
    %c0_104 = arith.constant 0 : index
    %182 = vector.load %arg3[%c4, %c0_103, %c0_104] : memref<6x16x16xf32, #tpu.memory_space<vmem>>, vector<1x16x16xf32>
    %183 = vector.shape_cast %182 : vector<1x16x16xf32> to vector<16x16xf32>
    %c4_105 = arith.constant 4 : index
    %c0_106 = arith.constant 0 : index
    %c0_107 = arith.constant 0 : index
    %184 = vector.load %arg4[%c4_105, %c0_106, %c0_107] : memref<6x16x16xf32, #tpu.memory_space<vmem>>, vector<1x16x16xf32>
    %185 = vector.shape_cast %184 : vector<1x16x16xf32> to vector<16x16xf32>
    %cst_108 = arith.constant dense<0.000000e+00> : vector<16x16xf32>
    %186 = tpu.matmul %0, %183, %cst_108 {dimension_numbers = #tpu.dot_dimension_numbers<[1], [0], [0], [1], [0, 0, 1, 1], [], []>} : vector<16x16xf32>, vector<16x16xf32>, vector<16x16xf32> -> vector<16x16xf32>
    %cst_109 = arith.constant dense<0.000000e+00> : vector<16x16xf32>
    %187 = tpu.matmul %186, %1, %cst_109 {dimension_numbers = #tpu.dot_dimension_numbers<[1], [0], [0], [1], [0, 0, 1, 1], [], []>} : vector<16x16xf32>, vector<16x16xf32>, vector<16x16xf32> -> vector<16x16xf32>
    %cst_110 = arith.constant dense<0.000000e+00> : vector<16x16xf32>
    %188 = tpu.matmul %0, %185, %cst_110 {dimension_numbers = #tpu.dot_dimension_numbers<[1], [0], [0], [1], [0, 0, 1, 1], [], []>} : vector<16x16xf32>, vector<16x16xf32>, vector<16x16xf32> -> vector<16x16xf32>
    %cst_111 = arith.constant dense<0.000000e+00> : vector<16x16xf32>
    %189 = tpu.matmul %188, %1, %cst_111 {dimension_numbers = #tpu.dot_dimension_numbers<[1], [0], [0], [1], [0, 0, 1, 1], [], []>} : vector<16x16xf32>, vector<16x16xf32>, vector<16x16xf32> -> vector<16x16xf32>
    %190 = arith.mulf %187, %187 : vector<16x16xf32>
    %191 = arith.mulf %189, %189 : vector<16x16xf32>
    %192 = arith.mulf %187, %189 : vector<16x16xf32>
    %193 = arith.mulf %183, %183 : vector<16x16xf32>
    %cst_112 = arith.constant dense<0.000000e+00> : vector<16x16xf32>
    %194 = tpu.matmul %0, %193, %cst_112 {dimension_numbers = #tpu.dot_dimension_numbers<[1], [0], [0], [1], [0, 0, 1, 1], [], []>} : vector<16x16xf32>, vector<16x16xf32>, vector<16x16xf32> -> vector<16x16xf32>
    %cst_113 = arith.constant dense<0.000000e+00> : vector<16x16xf32>
    %195 = tpu.matmul %194, %1, %cst_113 {dimension_numbers = #tpu.dot_dimension_numbers<[1], [0], [0], [1], [0, 0, 1, 1], [], []>} : vector<16x16xf32>, vector<16x16xf32>, vector<16x16xf32> -> vector<16x16xf32>
    %196 = arith.subf %195, %190 : vector<16x16xf32>
    %197 = arith.mulf %185, %185 : vector<16x16xf32>
    %cst_114 = arith.constant dense<0.000000e+00> : vector<16x16xf32>
    %198 = tpu.matmul %0, %197, %cst_114 {dimension_numbers = #tpu.dot_dimension_numbers<[1], [0], [0], [1], [0, 0, 1, 1], [], []>} : vector<16x16xf32>, vector<16x16xf32>, vector<16x16xf32> -> vector<16x16xf32>
    %cst_115 = arith.constant dense<0.000000e+00> : vector<16x16xf32>
    %199 = tpu.matmul %198, %1, %cst_115 {dimension_numbers = #tpu.dot_dimension_numbers<[1], [0], [0], [1], [0, 0, 1, 1], [], []>} : vector<16x16xf32>, vector<16x16xf32>, vector<16x16xf32> -> vector<16x16xf32>
    %200 = arith.subf %199, %191 : vector<16x16xf32>
    %201 = arith.mulf %183, %185 : vector<16x16xf32>
    %cst_116 = arith.constant dense<0.000000e+00> : vector<16x16xf32>
    %202 = tpu.matmul %0, %201, %cst_116 {dimension_numbers = #tpu.dot_dimension_numbers<[1], [0], [0], [1], [0, 0, 1, 1], [], []>} : vector<16x16xf32>, vector<16x16xf32>, vector<16x16xf32> -> vector<16x16xf32>
    %cst_117 = arith.constant dense<0.000000e+00> : vector<16x16xf32>
    %203 = tpu.matmul %202, %1, %cst_117 {dimension_numbers = #tpu.dot_dimension_numbers<[1], [0], [0], [1], [0, 0, 1, 1], [], []>} : vector<16x16xf32>, vector<16x16xf32>, vector<16x16xf32> -> vector<16x16xf32>
    %204 = arith.subf %203, %192 : vector<16x16xf32>
    %cst_118 = arith.constant 2.000000e+00 : f32
    %205 = vector.broadcast %cst_118 : f32 to vector<16x16xf32>
    %206 = arith.mulf %205, %204 : vector<16x16xf32>
    %cst_119 = arith.constant 5.852250e+01 : f32
    %207 = vector.broadcast %cst_119 : f32 to vector<16x16xf32>
    %208 = arith.addf %206, %207 : vector<16x16xf32>
    %209 = arith.addf %196, %200 : vector<16x16xf32>
    %cst_120 = arith.constant 5.852250e+01 : f32
    %210 = vector.broadcast %cst_120 : f32 to vector<16x16xf32>
    %211 = arith.addf %209, %210 : vector<16x16xf32>
    %cst_121 = arith.constant 2.000000e+00 : f32
    %212 = vector.broadcast %cst_121 : f32 to vector<16x16xf32>
    %213 = arith.mulf %212, %192 : vector<16x16xf32>
    %cst_122 = arith.constant 6.502500e+00 : f32
    %214 = vector.broadcast %cst_122 : f32 to vector<16x16xf32>
    %215 = arith.addf %213, %214 : vector<16x16xf32>
    %216 = arith.mulf %215, %208 : vector<16x16xf32>
    %217 = arith.addf %190, %191 : vector<16x16xf32>
    %cst_123 = arith.constant 6.502500e+00 : f32
    %218 = vector.broadcast %cst_123 : f32 to vector<16x16xf32>
    %219 = arith.addf %217, %218 : vector<16x16xf32>
    %220 = arith.mulf %219, %211 : vector<16x16xf32>
    %221 = arith.divf %216, %220 : vector<16x16xf32>
    %cst_124 = arith.constant 1.000000e+00 : f32
    %222 = vector.broadcast %cst_124 : f32 to vector<16x16xf32>
    %223 = arith.subf %222, %221 : vector<16x16xf32>
    %c4_125 = arith.constant 4 : index
    %c0_126 = arith.constant 0 : index
    %c0_127 = arith.constant 0 : index
    %224 = vector.load %arg5[%c4_125, %c0_126, %c0_127] : memref<6x16x16xf32, #tpu.memory_space<vmem>>, vector<1x16x16xf32>
    %225 = vector.shape_cast %224 : vector<1x16x16xf32> to vector<16x16xf32>
    %226 = vector.shape_cast %223 : vector<16x16xf32> to vector<1x16x16xf32>
    tpu.vector_store %arg5[%c4_125, %c0_126, %c0_127], %226 {strides = array<i32>} : memref<6x16x16xf32, #tpu.memory_space<vmem>>, vector<1x16x16xf32>,
    %c5 = arith.constant 5 : index
    %c0_128 = arith.constant 0 : index
    %c0_129 = arith.constant 0 : index
    %227 = vector.load %arg3[%c5, %c0_128, %c0_129] : memref<6x16x16xf32, #tpu.memory_space<vmem>>, vector<1x16x16xf32>
    %228 = vector.shape_cast %227 : vector<1x16x16xf32> to vector<16x16xf32>
    %c5_130 = arith.constant 5 : index
    %c0_131 = arith.constant 0 : index
    %c0_132 = arith.constant 0 : index
    %229 = vector.load %arg4[%c5_130, %c0_131, %c0_132] : memref<6x16x16xf32, #tpu.memory_space<vmem>>, vector<1x16x16xf32>
    %230 = vector.shape_cast %229 : vector<1x16x16xf32> to vector<16x16xf32>
    %cst_133 = arith.constant dense<0.000000e+00> : vector<16x16xf32>
    %231 = tpu.matmul %0, %228, %cst_133 {dimension_numbers = #tpu.dot_dimension_numbers<[1], [0], [0], [1], [0, 0, 1, 1], [], []>} : vector<16x16xf32>, vector<16x16xf32>, vector<16x16xf32> -> vector<16x16xf32>
    %cst_134 = arith.constant dense<0.000000e+00> : vector<16x16xf32>
    %232 = tpu.matmul %231, %1, %cst_134 {dimension_numbers = #tpu.dot_dimension_numbers<[1], [0], [0], [1], [0, 0, 1, 1], [], []>} : vector<16x16xf32>, vector<16x16xf32>, vector<16x16xf32> -> vector<16x16xf32>
    %cst_135 = arith.constant dense<0.000000e+00> : vector<16x16xf32>
    %233 = tpu.matmul %0, %230, %cst_135 {dimension_numbers = #tpu.dot_dimension_numbers<[1], [0], [0], [1], [0, 0, 1, 1], [], []>} : vector<16x16xf32>, vector<16x16xf32>, vector<16x16xf32> -> vector<16x16xf32>
    %cst_136 = arith.constant dense<0.000000e+00> : vector<16x16xf32>
    %234 = tpu.matmul %233, %1, %cst_136 {dimension_numbers = #tpu.dot_dimension_numbers<[1], [0], [0], [1], [0, 0, 1, 1], [], []>} : vector<16x16xf32>, vector<16x16xf32>, vector<16x16xf32> -> vector<16x16xf32>
    %235 = arith.mulf %232, %232 : vector<16x16xf32>
    %236 = arith.mulf %234, %234 : vector<16x16xf32>
    %237 = arith.mulf %232, %234 : vector<16x16xf32>
    %238 = arith.mulf %228, %228 : vector<16x16xf32>
    %cst_137 = arith.constant dense<0.000000e+00> : vector<16x16xf32>
    %239 = tpu.matmul %0, %238, %cst_137 {dimension_numbers = #tpu.dot_dimension_numbers<[1], [0], [0], [1], [0, 0, 1, 1], [], []>} : vector<16x16xf32>, vector<16x16xf32>, vector<16x16xf32> -> vector<16x16xf32>
    %cst_138 = arith.constant dense<0.000000e+00> : vector<16x16xf32>
    %240 = tpu.matmul %239, %1, %cst_138 {dimension_numbers = #tpu.dot_dimension_numbers<[1], [0], [0], [1], [0, 0, 1, 1], [], []>} : vector<16x16xf32>, vector<16x16xf32>, vector<16x16xf32> -> vector<16x16xf32>
    %241 = arith.subf %240, %235 : vector<16x16xf32>
    %242 = arith.mulf %230, %230 : vector<16x16xf32>
    %cst_139 = arith.constant dense<0.000000e+00> : vector<16x16xf32>
    %243 = tpu.matmul %0, %242, %cst_139 {dimension_numbers = #tpu.dot_dimension_numbers<[1], [0], [0], [1], [0, 0, 1, 1], [], []>} : vector<16x16xf32>, vector<16x16xf32>, vector<16x16xf32> -> vector<16x16xf32>
    %cst_140 = arith.constant dense<0.000000e+00> : vector<16x16xf32>
    %244 = tpu.matmul %243, %1, %cst_140 {dimension_numbers = #tpu.dot_dimension_numbers<[1], [0], [0], [1], [0, 0, 1, 1], [], []>} : vector<16x16xf32>, vector<16x16xf32>, vector<16x16xf32> -> vector<16x16xf32>
    %245 = arith.subf %244, %236 : vector<16x16xf32>
    %246 = arith.mulf %228, %230 : vector<16x16xf32>
    %cst_141 = arith.constant dense<0.000000e+00> : vector<16x16xf32>
    %247 = tpu.matmul %0, %246, %cst_141 {dimension_numbers = #tpu.dot_dimension_numbers<[1], [0], [0], [1], [0, 0, 1, 1], [], []>} : vector<16x16xf32>, vector<16x16xf32>, vector<16x16xf32> -> vector<16x16xf32>
    %cst_142 = arith.constant dense<0.000000e+00> : vector<16x16xf32>
    %248 = tpu.matmul %247, %1, %cst_142 {dimension_numbers = #tpu.dot_dimension_numbers<[1], [0], [0], [1], [0, 0, 1, 1], [], []>} : vector<16x16xf32>, vector<16x16xf32>, vector<16x16xf32> -> vector<16x16xf32>
    %249 = arith.subf %248, %237 : vector<16x16xf32>
    %cst_143 = arith.constant 2.000000e+00 : f32
    %250 = vector.broadcast %cst_143 : f32 to vector<16x16xf32>
    %251 = arith.mulf %250, %249 : vector<16x16xf32>
    %cst_144 = arith.constant 5.852250e+01 : f32
    %252 = vector.broadcast %cst_144 : f32 to vector<16x16xf32>
    %253 = arith.addf %251, %252 : vector<16x16xf32>
    %254 = arith.addf %241, %245 : vector<16x16xf32>
    %cst_145 = arith.constant 5.852250e+01 : f32
    %255 = vector.broadcast %cst_145 : f32 to vector<16x16xf32>
    %256 = arith.addf %254, %255 : vector<16x16xf32>
    %cst_146 = arith.constant 2.000000e+00 : f32
    %257 = vector.broadcast %cst_146 : f32 to vector<16x16xf32>
    %258 = arith.mulf %257, %237 : vector<16x16xf32>
    %cst_147 = arith.constant 6.502500e+00 : f32
    %259 = vector.broadcast %cst_147 : f32 to vector<16x16xf32>
    %260 = arith.addf %258, %259 : vector<16x16xf32>
    %261 = arith.mulf %260, %253 : vector<16x16xf32>
    %262 = arith.addf %235, %236 : vector<16x16xf32>
    %cst_148 = arith.constant 6.502500e+00 : f32
    %263 = vector.broadcast %cst_148 : f32 to vector<16x16xf32>
    %264 = arith.addf %262, %263 : vector<16x16xf32>
    %265 = arith.mulf %264, %256 : vector<16x16xf32>
    %266 = arith.divf %261, %265 : vector<16x16xf32>
    %cst_149 = arith.constant 1.000000e+00 : f32
    %267 = vector.broadcast %cst_149 : f32 to vector<16x16xf32>
    %268 = arith.subf %267, %266 : vector<16x16xf32>
    %c5_150 = arith.constant 5 : index
    %c0_151 = arith.constant 0 : index
    %c0_152 = arith.constant 0 : index
    %269 = vector.load %arg5[%c5_150, %c0_151, %c0_152] : memref<6x16x16xf32, #tpu.memory_space<vmem>>, vector<1x16x16xf32>
    %270 = vector.shape_cast %269 : vector<1x16x16xf32> to vector<16x16xf32>
    %271 = vector.shape_cast %268 : vector<16x16xf32> to vector<1x16x16xf32>
    tpu.vector_store %arg5[%c5_150, %c0_151, %c0_152], %271 {strides = array<i32>} : memref<6x16x16xf32, #tpu.memory_space<vmem>>, vector<1x16x16xf32>,
    return
  }
  func.func @transform_0(%arg0: i32) -> (i32, i32) {
    %c0_i32 = arith.constant 0 : i32
    %c0_i32_0 = arith.constant 0 : i32
    %c0_i32_1 = arith.constant 0 : i32
    return %c0_i32, %c0_i32_0 : i32, i32
  }
  func.func @transform_1(%arg0: i32) -> (i32, i32) {
    %c0_i32 = arith.constant 0 : i32
    %c0_i32_0 = arith.constant 0 : i32
    %c0_i32_1 = arith.constant 0 : i32
    return %c0_i32, %c0_i32_0 : i32, i32
  }
  func.func @transform_2(%arg0: i32) -> (i32, i32, i32) {
    %c0_i32 = arith.constant 0 : i32
    %c0_i32_0 = arith.constant 0 : i32
    %c0_i32_1 = arith.constant 0 : i32
    return %arg0, %c0_i32, %c0_i32_0 : i32, i32, i32
  }
  func.func @transform_3(%arg0: i32) -> (i32, i32, i32) {
    %c0_i32 = arith.constant 0 : i32
    %c0_i32_0 = arith.constant 0 : i32
    %c0_i32_1 = arith.constant 0 : i32
    return %arg0, %c0_i32, %c0_i32_0 : i32, i32, i32
  }
  func.func @transform_4(%arg0: i32) -> (i32, i32, i32) {
    %c0_i32 = arith.constant 0 : i32
    %c0_i32_0 = arith.constant 0 : i32
    %c0_i32_1 = arith.constant 0 : i32
    return %arg0, %c0_i32, %c0_i32_0 : i32, i32, i32
  }
}

</mosaic_0001>

<bundles_post_ra>
// kernel: tpu_custom_call.1
= control target key start
LH: loop header
LB: loop body
LE: loop exit
PB: predicated region body
PF: predicated region fallthrough
CT: control target
= control target key end

     0   :  { %9 = vsyncpa [#allocation3], 0  ;;  %s6646_s0 = inlined_call_operand.hbm [shape: f32[16,16], index: 0, kind: input, shape index: {}]   ;;  %s6647_s1 = inlined_call_operand.hbm [shape: f32[16,16], index: 1, kind: input, shape index: {}]   ;;  %s6648_s2 = inlined_call_operand.hbm [shape: f32[6,16,16], index: 2, kind: input, shape index: {}]   ;;  %s6649_s3 = inlined_call_operand.hbm [shape: f32[6,16,16], index: 3, kind: input, shape index: {}]   ;;  %s6650_s4 = inlined_call_operand.hbm [shape: f32[6,16,16], index: 4, kind: output, shape index: {}]  }
   0x1   :  { %10 = vsyncpa [#allocation6], 0 }
   0x2   :  { %11 = vsyncpa [#allocation9], 0 }
   0x3   :  { %12 = vsyncpa [#allocation4], 0  ;;  %s6267_s15 = smov [#allocation5]   ;;  %s6268_s17 = smov [#allocation2]  }
   0x4   :  { %s30_s16 = sshll.u32 %s6267_s15, 4  ;;  %s18_s18 = sshll.u32 %s6268_s17, 4  ;;  %s31_s16 = int_to_ptr.vmem [resolvable:$true] %s30_s16  ;;  %s6299_s18 = int_to_ptr.vmem [resolvable:$true] %s18_s18 }
   0x5   :  { %s6149_s21 = scalar_lea.hbm %s6647_s1, 256 }
   0x6   :  { %p6150_p0 = scmp.ne.s32.totalorder %s6647_s1, %s6149_s21  ;;  %p6153_p1 = scmp.lt.u32.totalorder %s6149_s21, %s6647_s1 }
   0x8   :  { %p6155_p2 = pnand %p6153_p1, %p6150_p0 }
   0xa   :  { %6158 = shalt.err (!%p6155_p2)
}
   0xb   :  { %s6159_s26 = scalar_lea.vmem %s31_s16, 256  ;;  %p6164_p4 = scmp.lt.s32.totalorder %s31_s16, %s31_s16 }
   0xc   :  { %p6160_p3 = scmp.ne.s32.totalorder %s31_s16, %s6159_s26  ;;  %p6165_p5 = scmp.lt.s32.totalorder %s6159_s26, %s6159_s26 }
   0xe   :  { %p6166_p6 = por %p6165_p5, %p6164_p4 }
  0x10   :  { %p6167_p7 = pnand %p6166_p6, %p6160_p3 }
  0x12   :  { %6170 = shalt.err (!%p6167_p7)
}
  0x13   :  { %s6269_s27 = smov 128   ;;  %s6270_s28 = smov 8  }
  0x14   :  { %36 = dma.hbm_to_vmem [thread:$0]  %s6647_s1, 256, %s31_s16, [#allocation6], %s6269_s27, %s6269_s27, %s6270_s28  }
  0x15   :  { %s6171_s7 = scalar_lea.hbm %s6646_s0, 256 }
  0x16   :  { %p6172_p8 = scmp.ne.s32.totalorder %s6646_s0, %s6171_s7  ;;  %p6175_p9 = scmp.lt.u32.totalorder %s6171_s7, %s6646_s0 }
  0x18   :  { %p6177_p10 = pnand %p6175_p9, %p6172_p8 }
  0x1a   :  { %6180 = shalt.err (!%p6177_p10)
}
  0x1b   :  { %s6181_s12 = scalar_lea.vmem %s6299_s18, 256  ;;  %p6186_p12 = scmp.lt.s32.totalorder %s6299_s18, %s6299_s18 }
  0x1c   :  { %p6182_p11 = scmp.ne.s32.totalorder %s6299_s18, %s6181_s12  ;;  %p6187_p13 = scmp.lt.s32.totalorder %s6181_s12, %s6181_s12 }
  0x1e   :  { %p6188_p0 = por %p6187_p13, %p6186_p12 }
  0x20   :  { %p6189_p1 = pnand %p6188_p0, %p6182_p11 }
  0x22   :  { %6192 = shalt.err (!%p6189_p1)
}
  0x23   :  { %24 = dma.hbm_to_vmem [thread:$0]  %s6646_s0, 256, %s6299_s18, [#allocation3], %s6269_s27, %s6269_s27, %s6270_s28  }
  0x24   :  { %s6271_s14 = smov [#allocation7]   ;;  %s6272_s16 = smov [#allocation8]  }
  0x25   :  { %s42_s15 = sshll.u32 %s6271_s14, 4  ;;  %s54_s17 = sshll.u32 %s6272_s16, 4  ;;  %s43_s15 = int_to_ptr.vmem [resolvable:$true] %s42_s15  ;;  %s6336_s17 = int_to_ptr.vmem [resolvable:$true] %s54_s17 }
  0x26   :  { %s6193_s21 = scalar_lea.hbm %s6648_s2, 1536 }
  0x27   :  { %p6194_p2 = scmp.ne.s32.totalorder %s6648_s2, %s6193_s21  ;;  %p6197_p3 = scmp.lt.u32.totalorder %s6193_s21, %s6648_s2 }
  0x29   :  { %p6199_p4 = pnand %p6197_p3, %p6194_p2 }
  0x2b   :  { %6202 = shalt.err (!%p6199_p4)
}
  0x2c   :  { %s6203_s0 = scalar_lea.vmem %s43_s15, 1536  ;;  %p6208_p6 = scmp.lt.s32.totalorder %s43_s15, %s43_s15 }
  0x2d   :  { %p6204_p5 = scmp.ne.s32.totalorder %s43_s15, %s6203_s0  ;;  %p6209_p7 = scmp.lt.s32.totalorder %s6203_s0, %s6203_s0 }
  0x2f   :  { %p6210_p8 = por %p6209_p7, %p6208_p6 }
  0x31   :  { %p6211_p9 = pnand %p6210_p8, %p6204_p5 }
  0x33   :  { %6214 = shalt.err (!%p6211_p9)
}
  0x34   :  { %48 = dma.hbm_to_vmem [thread:$0]  %s6648_s2, 1536, %s43_s15, [#allocation6], %s6269_s27, %s6269_s27, %s6270_s28  }
  0x35   :  { %s6215_s5 = scalar_lea.hbm %s6649_s3, 1536 }
  0x36   :  { %p6216_p10 = scmp.ne.s32.totalorder %s6649_s3, %s6215_s5  ;;  %p6219_p11 = scmp.lt.u32.totalorder %s6215_s5, %s6649_s3 }
  0x38   :  { %p6221_p12 = pnand %p6219_p11, %p6216_p10 }
  0x3a   :  { %6224 = shalt.err (!%p6221_p12)
}
  0x3b   :  { %s6225_s10 = scalar_lea.vmem %s6336_s17, 1536  ;;  %p6230_p0 = scmp.lt.s32.totalorder %s6336_s17, %s6336_s17 }
  0x3c   :  { %p6226_p13 = scmp.ne.s32.totalorder %s6336_s17, %s6225_s10  ;;  %p6231_p1 = scmp.lt.s32.totalorder %s6225_s10, %s6225_s10 }
  0x3e   :  { %p6232_p2 = por %p6231_p1, %p6230_p0 }
  0x40   :  { %p6233_p3 = pnand %p6232_p2, %p6226_p13 }
  0x42   :  { %6236 = shalt.err (!%p6233_p3)
}
  0x43   :  { %60 = dma.hbm_to_vmem [thread:$0]  %s6649_s3, 1536, %s6336_s17, [#allocation9], %s6269_s27, %s6269_s27, %s6270_s28  }
  0x44   :  { %6259 = dma.done.wait [#allocation3], 256  }
  0x45   :  { %6260 = vsyncadd [#allocation3], 4294967040 }
  0x46   :  { %6261 = dma.done.wait [#allocation6], 1792  }
  0x47   :  { %6262 = vsyncadd [#allocation6], 4294965504 }
  0x48   :  { %6263 = dma.done.wait [#allocation9], 1536  }
  0x49   :  { %6264 = vsyncadd [#allocation9], 4294965760  ;;  %vm81_vm0 = vcmask 130048   ;;  %v77_v0 = vld [vmem:[#allocation7] sm:$0xff]  ;;  %v78_v1 = vld [vmem:[#allocation7 + $0x8] sm:$0xff]  ;;  %s6273_s3 = smov [#allocation10]  }
  0x4a   :  { %v6373_v2 = vld [vmem:[#allocation2] sm:$0xff]  ;;  %v5878_v3 = vpack.c.bf16 %v78_v1, %v77_v0  ;;  %v80_v5 = vld [vmem:[#allocation8 + $0x8] sm:$0xff]  ;;  %v406_v6 = vmul.f32 %v77_v0, %v77_v0  ;;  %v407_v7 = vmul.f32 %v78_v1, %v78_v1  ;;  %v915_v17 = vld [vmem:[#allocation7 + $0x10] sm:$0xff]  ;;  %s5084_s12 = sshll.u32 %s6273_s3, 4  ;;  %s5085_s12 = int_to_ptr.vmem [resolvable:$true] %s5084_s12 }
  0x4b   :  { %5462 = vmatprep.mubr.msk.f32.mxu0 %vm81_vm0, %v6373_v2  ;;  %v79_v4 = vld [vmem:[#allocation8] sm:$0xff]  ;;  %v6377_v9 = vld [vmem:[#allocation2 + $0x8] sm:$0xff]  ;;  %v567_v12 = vmul.f32 %v80_v5, %v80_v5  ;;  %v727_v15 = vmul.f32 %v80_v5, %v78_v1  ;;  %v916_v18 = vld [vmem:[#allocation7 + $0x18] sm:$0xff]  ;;  %v1238_v26 = vmul.f32 %v915_v17, %v915_v17  ;;  %s6237_s1 = scalar_lea.vmem %s5085_s12, 1536  ;;  %p6242_p5 = scmp.lt.s32.totalorder %s5085_s12, %s5085_s12 }
  0x4c   :  { %v5886_v8 = vpack.c.bf16 %v80_v5, %v79_v4  ;;  %5879 = vmatprep.subr.bf16.mxu0 %v5878_v3  ;;  %v5894_v10 = vpack.c.bf16 %v407_v7, %v406_v6  ;;  %v566_v11 = vmul.f32 %v79_v4, %v79_v4  ;;  %v726_v14 = vmul.f32 %v79_v4, %v77_v0  ;;  %v75_v19 = vld [vmem:[#allocation5] sm:$0xff]  ;;  %v76_v20 = vld [vmem:[#allocation5 + $0x8] sm:$0xff]  ;;  %v1748_v35 = vld [vmem:[#allocation7 + $0x20] sm:$0xff]  ;;  %p6238_p4 = scmp.ne.s32.totalorder %s5085_s12, %s6237_s1  ;;  %p6243_p6 = scmp.lt.s32.totalorder %s6237_s1, %s6237_s1 }
  0x4d   :  { %5881 = vmatpush3.bf16.msra.mxu0 %v5878_v3  ;;  %v5918_v21 = vpack.c.bf16 %v916_v18, %v915_v17  ;;  %v918_v22 = vld [vmem:[#allocation8 + $0x10] sm:$0xff]  ;;  %v919_v23 = vld [vmem:[#allocation8 + $0x18] sm:$0xff]  ;;  %v6391_v24 = vpack.c.bf16 %v76_v20, %v75_v19  ;;  %v1239_v27 = vmul.f32 %v916_v18, %v916_v18  ;;  %v1749_v36 = vld [vmem:[#allocation7 + $0x28] sm:$0xff]  ;;  %v2071_v41 = vmul.f32 %v1748_v35, %v1748_v35 }
  0x4e   :  { %5887 = vmatprep.subr.bf16.mxu0 %v5886_v8  ;;  %v5902_v13 = vpack.c.bf16 %v567_v12, %v566_v11  ;;  %v5910_v16 = vpack.c.bf16 %v727_v15, %v726_v14  ;;  %v5926_v25 = vpack.c.bf16 %v919_v23, %v918_v22  ;;  %v1398_v29 = vmul.f32 %v918_v22, %v918_v22  ;;  %v1751_v38 = vld [vmem:[#allocation8 + $0x20] sm:$0xff]  ;;  %v1752_v39 = vld [vmem:[#allocation8 + $0x28] sm:$0xff]  ;;  %v2581_v50 = vld [vmem:[#allocation7 + $0x30] sm:$0xff]  ;;  %p6244_p7 = por %p6243_p6, %p6242_p5 }
  0x4f   :  { %5883 = vmatprep.subr.bf16.mxu1 %v6391_v24  ;;  %v5934_v28 = vpack.c.bf16 %v1239_v27, %v1238_v26  ;;  %v1399_v30 = vmul.f32 %v919_v23, %v919_v23  ;;  %v1558_v32 = vmul.f32 %v918_v22, %v915_v17  ;;  %v1559_v33 = vmul.f32 %v919_v23, %v916_v18  ;;  %v2582_v51 = vld [vmem:[#allocation7 + $0x38] sm:$0xff]  ;;  %v2584_v53 = vld [vmem:[#allocation8 + $0x30] sm:$0xff]  ;;  %v3414_v1 = vld [vmem:[#allocation7 + $0x40] sm:$0xff] }
  0x50   :  { %5463 = vmatmul.mubr.msk.f32.vlgmr.msra.gmra.mrb[0].mxu0 %vm81_vm0, %v6377_v9  ;;  %5885 = vmatpush3.bf16.msra.mxu1 %v6391_v24  ;;  %v5958_v37 = vpack.c.bf16 %v1749_v36, %v1748_v35  ;;  %v5966_v40 = vpack.c.bf16 %v1752_v39, %v1751_v38  ;;  %v2072_v42 = vmul.f32 %v1749_v36, %v1749_v36  ;;  %v2585_v54 = vld [vmem:[#allocation8 + $0x38] sm:$0xff]  ;;  %v3415_v3 = vld [vmem:[#allocation7 + $0x48] sm:$0xff]  ;;  %v3417_v5 = vld [vmem:[#allocation8 + $0x40] sm:$0xff]  ;;  %p6245_p8 = pnand %p6244_p7, %p6238_p4 }
  0x51   :  { %5889 = vmatpush3.bf16.msra.mxu0 %v5886_v8  ;;  %5476 = vmatprep.mubr.msk.f32.mxu0 %vm81_vm0, %v6373_v2  ;;  %v5942_v31 = vpack.c.bf16 %v1399_v30, %v1398_v29  ;;  %v5950_v34 = vpack.c.bf16 %v1559_v33, %v1558_v32  ;;  %v2231_v44 = vmul.f32 %v1751_v38, %v1751_v38  ;;  %v3418_v6 = vld [vmem:[#allocation8 + $0x48] sm:$0xff]  ;;  %v4247_v18 = vld [vmem:[#allocation7 + $0x50] sm:$0xff]  ;;  %v4248_v19 = vld [vmem:[#allocation7 + $0x58] sm:$0xff] }
  0x52   :  { %5895 = vmatprep.subr.bf16.mxu0 %v5894_v10  ;;  %5891 = vmatprep.subr.bf16.mxu1 %v6391_v24  ;;  %v5974_v43 = vpack.c.bf16 %v2072_v42, %v2071_v41  ;;  %v2232_v45 = vmul.f32 %v1752_v39, %v1752_v39  ;;  %v2391_v47 = vmul.f32 %v1751_v38, %v1748_v35  ;;  %v4251_v22 = vld [vmem:[#allocation8 + $0x58] sm:$0xff] }
  0x53   :  { %v2392_v48 = vmul.f32 %v1752_v39, %v1749_v36  ;;  %v5998_v52 = vpack.c.bf16 %v2582_v51, %v2581_v50  ;;  %v6006_v55 = vpack.c.bf16 %v2585_v54, %v2584_v53  ;;  %v2904_v56 = vmul.f32 %v2581_v50, %v2581_v50 }
  0x54   :  { %5477 = vmatmul.mubr.msk.f32.vlgmr.msra.gmra.mrb[2].mxu0 %vm81_vm0, %v6377_v9  ;;  %v5982_v46 = vpack.c.bf16 %v2232_v45, %v2231_v44  ;;  %v2905_v57 = vmul.f32 %v2582_v51, %v2582_v51  ;;  %v3064_v59 = vmul.f32 %v2584_v53, %v2584_v53  ;;  %v3065_v60 = vmul.f32 %v2585_v54, %v2585_v54 }
  0x55   :  { %5897 = vmatpush3.bf16.msra.mxu0 %v5894_v10  ;;  %5490 = vmatprep.mubr.msk.f32.mxu0 %vm81_vm0, %v6373_v2  ;;  %v5990_v49 = vpack.c.bf16 %v2392_v48, %v2391_v47  ;;  %v3224_v62 = vmul.f32 %v2584_v53, %v2581_v50  ;;  %v3225_v63 = vmul.f32 %v2585_v54, %v2582_v51 }
  0x56   :  { %5903 = vmatprep.subr.bf16.mxu0 %v5902_v13  ;;  %v6014_v58 = vpack.c.bf16 %v2905_v57, %v2904_v56  ;;  %v6022_v61 = vpack.c.bf16 %v3065_v60, %v3064_v59  ;;  %v6038_v4 = vpack.c.bf16 %v3415_v3, %v3414_v1  ;;  %v6046_v7 = vpack.c.bf16 %v3418_v6, %v3417_v5 }
  0x57   :  { %v6030_v0 = vpack.c.bf16 %v3225_v63, %v3224_v62  ;;  %v3737_v8 = vmul.f32 %v3414_v1, %v3414_v1  ;;  %v3738_v10 = vmul.f32 %v3415_v3, %v3415_v3  ;;  %v3897_v12 = vmul.f32 %v3417_v5, %v3417_v5 }
  0x58   :  { %5491 = vmatmul.mubr.msk.f32.vlgmr.msra.gmra.mrb[4].mxu0 %vm81_vm0, %v6377_v9  ;;  %v4057_v15 = vmul.f32 %v3417_v5, %v3414_v1  ;;  %v6078_v20 = vpack.c.bf16 %v4248_v19, %v4247_v18  ;;  %v4571_v26 = vmul.f32 %v4248_v19, %v4248_v19  ;;  %v4731_v29 = vmul.f32 %v4251_v22, %v4251_v22 }
  0x59   :  { %5905 = vmatpush3.bf16.msra.mxu0 %v5902_v13  ;;  %5504 = vmatprep.mubr.msk.f32.mxu0 %vm81_vm0, %v6373_v2  ;;  %v6054_v11 = vpack.c.bf16 %v3738_v10, %v3737_v8  ;;  %v3898_v13 = vmul.f32 %v3418_v6, %v3418_v6  ;;  %v4891_v32 = vmul.f32 %v4251_v22, %v4248_v19 }
  0x5a   :  { %5911 = vmatprep.subr.bf16.mxu0 %v5910_v16 }
  0x5b   :  { %v6062_v14 = vpack.c.bf16 %v3898_v13, %v3897_v12 }
  0x5c   :  { %5505 = vmatmul.mubr.msk.f32.vlgmr.msra.gmra.mrb[6].mxu0 %vm81_vm0, %v6377_v9 }
  0x5d   :  { %5913 = vmatpush3.bf16.msra.mxu0 %v5910_v16  ;;  %5518 = vmatprep.mubr.msk.f32.mxu0 %vm81_vm0, %v6373_v2  ;;  %v4058_v16 = vmul.f32 %v3418_v6, %v3415_v3 }
  0x5e   :  { %5919 = vmatprep.subr.bf16.mxu0 %v5918_v21 }
  0x5f   :  { %v6070_v17 = vpack.c.bf16 %v4058_v16, %v4057_v15 }
  0x60   :  { %5519 = vmatmul.mubr.msk.f32.vlgmr.msra.gmra.mrb[8].mxu0 %vm81_vm0, %v6377_v9 }
  0x61   :  { %5921 = vmatpush3.bf16.msra.mxu0 %v5918_v21  ;;  %5532 = vmatprep.mubr.msk.f32.mxu0 %vm81_vm0, %v6373_v2  ;;  %v4250_v21 = vld [vmem:[#allocation8 + $0x50] sm:$0xff] }
  0x62   :  { %5927 = vmatprep.subr.bf16.mxu0 %v5926_v25  ;;  %v6086_v23 = vpack.c.bf16 %v4251_v22, %v4250_v21 }
  0x64   :  { %5533 = vmatmul.mubr.msk.f32.vlgmr.msra.gmra.mrb[10].mxu0 %vm81_vm0, %v6377_v9 }
  0x65   :  { %5929 = vmatpush3.bf16.msra.mxu0 %v5926_v25  ;;  %5546 = vmatprep.mubr.msk.f32.mxu0 %vm81_vm0, %v6373_v2  ;;  %v4570_v25 = vmul.f32 %v4247_v18, %v4247_v18 }
  0x66   :  { %5935 = vmatprep.subr.bf16.mxu0 %v5934_v28 }
  0x67   :  { %v6094_v27 = vpack.c.bf16 %v4571_v26, %v4570_v25 }
  0x68   :  { %5547 = vmatmul.mubr.msk.f32.vlgmr.msra.gmra.mrb[12].mxu0 %vm81_vm0, %v6377_v9 }
  0x69   :  { %5937 = vmatpush3.bf16.msra.mxu0 %v5934_v28  ;;  %5560 = vmatprep.mubr.msk.f32.mxu0 %vm81_vm0, %v6373_v2  ;;  %v4730_v28 = vmul.f32 %v4250_v21, %v4250_v21 }
  0x6a   :  { %5943 = vmatprep.subr.bf16.mxu0 %v5942_v31 }
  0x6b   :  { %v6102_v30 = vpack.c.bf16 %v4731_v29, %v4730_v28 }
  0x6c   :  { %5561 = vmatmul.mubr.msk.f32.vlgmr.msra.gmra.mrb[14].mxu0 %vm81_vm0, %v6377_v9 }
  0x6d   :  { %5945 = vmatpush3.bf16.msra.mxu0 %v5942_v31  ;;  %5574 = vmatprep.mubr.msk.f32.mxu0 %vm81_vm0, %v6373_v2  ;;  %v4890_v31 = vmul.f32 %v4250_v21, %v4247_v18 }
  0x6e   :  { %5951 = vmatprep.subr.bf16.mxu0 %v5950_v34 }
  0x6f   :  { %v6110_v33 = vpack.c.bf16 %v4891_v32, %v4890_v31 }
  0x70   :  { %5575 = vmatmul.mubr.msk.f32.vlgmr.msra.gmra.mrb[16].mxu0 %vm81_vm0, %v6377_v9 }
  0x71   :  { %5953 = vmatpush3.bf16.msra.mxu0 %v5950_v34  ;;  %5588 = vmatprep.mubr.msk.f32.mxu0 %vm81_vm0, %v6373_v2 }
  0x72   :  { %5959 = vmatprep.subr.bf16.mxu0 %v5958_v37 }
  0x74   :  { %5589 = vmatmul.mubr.msk.f32.vlgmr.msra.gmra.mrb[18].mxu0 %vm81_vm0, %v6377_v9 }
  0x75   :  { %5961 = vmatpush3.bf16.msra.mxu0 %v5958_v37  ;;  %5602 = vmatprep.mubr.msk.f32.mxu0 %vm81_vm0, %v6373_v2 }
  0x76   :  { %5967 = vmatprep.subr.bf16.mxu0 %v5966_v40 }
  0x78   :  { %5603 = vmatmul.mubr.msk.f32.vlgmr.msra.gmra.mrb[20].mxu0 %vm81_vm0, %v6377_v9 }
  0x79   :  { %5969 = vmatpush3.bf16.msra.mxu0 %v5966_v40  ;;  %5616 = vmatprep.mubr.msk.f32.mxu0 %vm81_vm0, %v6373_v2 }
  0x7a   :  { %5975 = vmatprep.subr.bf16.mxu0 %v5974_v43 }
  0x7c   :  { %5617 = vmatmul.mubr.msk.f32.vlgmr.msra.gmra.mrb[22].mxu0 %vm81_vm0, %v6377_v9 }
  0x7d   :  { %5977 = vmatpush3.bf16.msra.mxu0 %v5974_v43  ;;  %5630 = vmatprep.mubr.msk.f32.mxu0 %vm81_vm0, %v6373_v2 }
  0x7e   :  { %5983 = vmatprep.subr.bf16.mxu0 %v5982_v46 }
  0x80   :  { %5631 = vmatmul.mubr.msk.f32.vlgmr.msra.gmra.mrb[24].mxu0 %vm81_vm0, %v6377_v9 }
  0x81   :  { %5985 = vmatpush3.bf16.msra.mxu0 %v5982_v46  ;;  %5644 = vmatprep.mubr.msk.f32.mxu0 %vm81_vm0, %v6373_v2 }
  0x82   :  { %5991 = vmatprep.subr.bf16.mxu0 %v5990_v49 }
  0x84   :  { %5645 = vmatmul.mubr.msk.f32.vlgmr.msra.gmra.mrb[26].mxu0 %vm81_vm0, %v6377_v9 }
  0x85   :  { %5993 = vmatpush3.bf16.msra.mxu0 %v5990_v49  ;;  %5658 = vmatprep.mubr.msk.f32.mxu0 %vm81_vm0, %v6373_v2 }
  0x86   :  { %5999 = vmatprep.subr.bf16.mxu0 %v5998_v52 }
  0x88   :  { %5659 = vmatmul.mubr.msk.f32.vlgmr.msra.gmra.mrb[28].mxu0 %vm81_vm0, %v6377_v9 }
  0x89   :  { %6001 = vmatpush3.bf16.msra.mxu0 %v5998_v52  ;;  %5672 = vmatprep.mubr.msk.f32.mxu0 %vm81_vm0, %v6373_v2 }
  0x8a   :  { %6007 = vmatprep.subr.bf16.mxu0 %v6006_v55 }
  0x8c   :  { %5673 = vmatmul.mubr.msk.f32.vlgmr.msra.gmra.mrb[30].mxu0 %vm81_vm0, %v6377_v9 }
  0x8d   :  { %6009 = vmatpush3.bf16.msra.mxu0 %v6006_v55  ;;  %5686 = vmatprep.mubr.msk.f32.mxu0 %vm81_vm0, %v6373_v2 }
  0x8e   :  { %6015 = vmatprep.subr.bf16.mxu0 %v6014_v58 }
  0x90   :  { %5687 = vmatmul.mubr.msk.f32.vlgmr.msra.gmra.mrb[32].mxu0 %vm81_vm0, %v6377_v9 }
  0x91   :  { %6017 = vmatpush3.bf16.msra.mxu0 %v6014_v58  ;;  %5700 = vmatprep.mubr.msk.f32.mxu0 %vm81_vm0, %v6373_v2 }
  0x92   :  { %6023 = vmatprep.subr.bf16.mxu0 %v6022_v61 }
  0x94   :  { %5701 = vmatmul.mubr.msk.f32.vlgmr.msra.gmra.mrb[34].mxu0 %vm81_vm0, %v6377_v9 }
  0x95   :  { %6025 = vmatpush3.bf16.msra.mxu0 %v6022_v61  ;;  %5714 = vmatprep.mubr.msk.f32.mxu0 %vm81_vm0, %v6373_v2 }
  0x96   :  { %6031 = vmatprep.subr.bf16.mxu0 %v6030_v0 }
  0x98   :  { %5715 = vmatmul.mubr.msk.f32.vlgmr.msra.gmra.mrb[36].mxu0 %vm81_vm0, %v6377_v9 }
  0x99   :  { %6033 = vmatpush3.bf16.msra.mxu0 %v6030_v0  ;;  %5728 = vmatprep.mubr.msk.f32.mxu0 %vm81_vm0, %v6373_v2 }
  0x9a   :  { %6039 = vmatprep.subr.bf16.mxu0 %v6038_v4 }
  0x9c   :  { %5729 = vmatmul.mubr.msk.f32.vlgmr.msra.gmra.mrb[38].mxu0 %vm81_vm0, %v6377_v9 }
  0x9d   :  { %6041 = vmatpush3.bf16.msra.mxu0 %v6038_v4  ;;  %5742 = vmatprep.mubr.msk.f32.mxu0 %vm81_vm0, %v6373_v2 }
  0x9e   :  { %6047 = vmatprep.subr.bf16.mxu0 %v6046_v7 }
  0xa0   :  { %5743 = vmatmul.mubr.msk.f32.vlgmr.msra.gmra.mrb[40].mxu0 %vm81_vm0, %v6377_v9 }
  0xa1   :  { %6049 = vmatpush3.bf16.msra.mxu0 %v6046_v7  ;;  %5756 = vmatprep.mubr.msk.f32.mxu0 %vm81_vm0, %v6373_v2 }
  0xa2   :  { %6055 = vmatprep.subr.bf16.mxu0 %v6054_v11 }
  0xa4   :  { %5757 = vmatmul.mubr.msk.f32.vlgmr.msra.gmra.mrb[42].mxu0 %vm81_vm0, %v6377_v9 }
  0xa5   :  { %6057 = vmatpush3.bf16.msra.mxu0 %v6054_v11  ;;  %5770 = vmatprep.mubr.msk.f32.mxu0 %vm81_vm0, %v6373_v2 }
  0xa6   :  { %6063 = vmatprep.subr.bf16.mxu0 %v6062_v14 }
  0xa8   :  { %5771 = vmatmul.mubr.msk.f32.vlgmr.msra.gmra.mrb[44].mxu0 %vm81_vm0, %v6377_v9 }
  0xa9   :  { %6065 = vmatpush3.bf16.msra.mxu0 %v6062_v14  ;;  %5784 = vmatprep.mubr.msk.f32.mxu0 %vm81_vm0, %v6373_v2 }
  0xaa   :  { %6071 = vmatprep.subr.bf16.mxu0 %v6070_v17 }
  0xac   :  { %5785 = vmatmul.mubr.msk.f32.vlgmr.msra.gmra.mrb[46].mxu0 %vm81_vm0, %v6377_v9 }
  0xad   :  { %6073 = vmatpush3.bf16.msra.mxu0 %v6070_v17  ;;  %5798 = vmatprep.mubr.msk.f32.mxu0 %vm81_vm0, %v6373_v2 }
  0xae   :  { %6079 = vmatprep.subr.bf16.mxu0 %v6078_v20 }
  0xb0   :  { %5799 = vmatmul.mubr.msk.f32.vlgmr.msra.gmra.mrb[48].mxu0 %vm81_vm0, %v6377_v9 }
  0xb1   :  { %6081 = vmatpush3.bf16.msra.mxu0 %v6078_v20  ;;  %5812 = vmatprep.mubr.msk.f32.mxu0 %vm81_vm0, %v6373_v2 }
  0xb2   :  { %6087 = vmatprep.subr.bf16.mxu0 %v6086_v23 }
  0xb4   :  { %5813 = vmatmul.mubr.msk.f32.vlgmr.msra.gmra.mrb[50].mxu0 %vm81_vm0, %v6377_v9 }
  0xb5   :  { %6089 = vmatpush3.bf16.msra.mxu0 %v6086_v23  ;;  %5826 = vmatprep.mubr.msk.f32.mxu0 %vm81_vm0, %v6373_v2 }
  0xb6   :  { %6095 = vmatprep.subr.bf16.mxu0 %v6094_v27 }
  0xb8   :  { %5827 = vmatmul.mubr.msk.f32.vlgmr.msra.gmra.mrb[52].mxu0 %vm81_vm0, %v6377_v9 }
  0xb9   :  { %6097 = vmatpush3.bf16.msra.mxu0 %v6094_v27  ;;  %5840 = vmatprep.mubr.msk.f32.mxu0 %vm81_vm0, %v6373_v2 }
  0xba   :  { %6103 = vmatprep.subr.bf16.mxu0 %v6102_v30 }
  0xbc   :  { %5841 = vmatmul.mubr.msk.f32.vlgmr.msra.gmra.mrb[54].mxu0 %vm81_vm0, %v6377_v9 }
  0xbd   :  { %6105 = vmatpush3.bf16.msra.mxu0 %v6102_v30  ;;  %5854 = vmatprep.mubr.msk.f32.mxu0 %vm81_vm0, %v6373_v2 }
  0xbe   :  { %6111 = vmatprep.subr.bf16.mxu0 %v6110_v33 }
  0xc0   :  { %5855 = vmatmul.mubr.msk.f32.vlgmr.msra.gmra.mrb[56].mxu0 %vm81_vm0, %v6377_v9 }
  0xc1   :  { %6113 = vmatpush3.bf16.msra.mxu0 %v6110_v33  ;;  %5868 = vmatprep.mubr.msk.f32.mxu0 %vm81_vm0, %v6373_v2 }
  0xc4   :  { %5869 = vmatmul.mubr.msk.f32.vlgmr.msra.gmra.mrb[58].mxu0 %vm81_vm0, %v6377_v9 }
 0x123   :  { %v5464_v34 = vpop.f32.mrb[0].mxu0 }
 0x124   :  { %v154_v35 = vpop.f32.mrb[1].mxu0 }
 0x125   :  { %5469 = vmatprep.mubr.msk.f32.mxu1 %vm81_vm0, %v154_v35 }
 0x126   :  { %5470 = vmatmul.mubr.msk.f32.vlgmr.msra.gmra.mrb[0].mxu1 %vm81_vm0, %v5464_v34 }
 0x127   :  { %v5478_v36 = vpop.f32.mrb[2].mxu0  ;;  %5893 = vmatpush3.bf16.msra.mxu1 %v6391_v24 }
 0x128   :  { %v310_v37 = vpop.f32.mrb[3].mxu0  ;;  %5899 = vmatprep.subr.bf16.mxu1 %v6391_v24 }
 0x129   :  { %5483 = vmatprep.mubr.msk.f32.mxu1 %vm81_vm0, %v310_v37 }
 0x12a   :  { %5484 = vmatmul.mubr.msk.f32.vlgmr.msra.gmra.mrb[2].mxu1 %vm81_vm0, %v5478_v36 }
 0x12b   :  { %v5492_v2 = vpop.f32.mrb[4].mxu0  ;;  %5901 = vmatpush3.bf16.msra.mxu1 %v6391_v24 }
 0x12c   :  { %v474_v9 = vpop.f32.mrb[5].mxu0  ;;  %5907 = vmatprep.subr.bf16.mxu1 %v6391_v24 }
 0x12d   :  { %5497 = vmatprep.mubr.msk.f32.mxu1 %vm81_vm0, %v474_v9 }
 0x12e   :  { %5498 = vmatmul.mubr.msk.f32.vlgmr.msra.gmra.mrb[4].mxu1 %vm81_vm0, %v5492_v2 }
 0x12f   :  { %v5506_v38 = vpop.f32.mrb[6].mxu0  ;;  %5909 = vmatpush3.bf16.msra.mxu1 %v6391_v24 }
 0x130   :  { %v634_v39 = vpop.f32.mrb[7].mxu0  ;;  %5915 = vmatprep.subr.bf16.mxu1 %v6391_v24 }
 0x131   :  { %5511 = vmatprep.mubr.msk.f32.mxu1 %vm81_vm0, %v634_v39 }
 0x132   :  { %5512 = vmatmul.mubr.msk.f32.vlgmr.msra.gmra.mrb[6].mxu1 %vm81_vm0, %v5506_v38 }
 0x133   :  { %v5520_v40 = vpop.f32.mrb[8].mxu0  ;;  %5917 = vmatpush3.bf16.msra.mxu1 %v6391_v24 }
 0x134   :  { %v794_v41 = vpop.f32.mrb[9].mxu0  ;;  %5923 = vmatprep.subr.bf16.mxu1 %v6391_v24 }
 0x135   :  { %5525 = vmatprep.mubr.msk.f32.mxu1 %vm81_vm0, %v794_v41 }
 0x136   :  { %5526 = vmatmul.mubr.msk.f32.vlgmr.msra.gmra.mrb[8].mxu1 %vm81_vm0, %v5520_v40 }
 0x137   :  { %v5534_v42 = vpop.f32.mrb[10].mxu0  ;;  %5925 = vmatpush3.bf16.msra.mxu1 %v6391_v24 }
 0x138   :  { %v986_v43 = vpop.f32.mrb[11].mxu0  ;;  %5931 = vmatprep.subr.bf16.mxu1 %v6391_v24 }
 0x139   :  { %5539 = vmatprep.mubr.msk.f32.mxu1 %vm81_vm0, %v986_v43 }
 0x13a   :  { %5540 = vmatmul.mubr.msk.f32.vlgmr.msra.gmra.mrb[10].mxu1 %vm81_vm0, %v5534_v42 }
 0x13b   :  { %v5548_v44 = vpop.f32.mrb[12].mxu0  ;;  %5933 = vmatpush3.bf16.msra.mxu1 %v6391_v24 }
 0x13c   :  { %v1142_v45 = vpop.f32.mrb[13].mxu0  ;;  %5939 = vmatprep.subr.bf16.mxu1 %v6391_v24 }
 0x13d   :  { %5553 = vmatprep.mubr.msk.f32.mxu1 %vm81_vm0, %v1142_v45 }
 0x13e   :  { %5554 = vmatmul.mubr.msk.f32.vlgmr.msra.gmra.mrb[12].mxu1 %vm81_vm0, %v5548_v44 }
 0x13f   :  { %v5562_v46 = vpop.f32.mrb[14].mxu0  ;;  %5941 = vmatpush3.bf16.msra.mxu1 %v6391_v24 }
 0x140   :  { %v1306_v47 = vpop.f32.mrb[15].mxu0  ;;  %5947 = vmatprep.subr.bf16.mxu1 %v6391_v24 }
 0x141   :  { %5567 = vmatprep.mubr.msk.f32.mxu1 %vm81_vm0, %v1306_v47 }
 0x142   :  { %5568 = vmatmul.mubr.msk.f32.vlgmr.msra.gmra.mrb[14].mxu1 %vm81_vm0, %v5562_v46 }
 0x143   :  { %v5576_v48 = vpop.f32.mrb[16].mxu0  ;;  %5949 = vmatpush3.bf16.msra.mxu1 %v6391_v24 }
 0x144   :  { %v1466_v49 = vpop.f32.mrb[17].mxu0  ;;  %5955 = vmatprep.subr.bf16.mxu1 %v6391_v24 }
 0x145   :  { %5581 = vmatprep.mubr.msk.f32.mxu1 %vm81_vm0, %v1466_v49 }
 0x146   :  { %5582 = vmatmul.mubr.msk.f32.vlgmr.msra.gmra.mrb[16].mxu1 %vm81_vm0, %v5576_v48 }
 0x147   :  { %v5590_v50 = vpop.f32.mrb[18].mxu0  ;;  %5957 = vmatpush3.bf16.msra.mxu1 %v6391_v24 }
 0x148   :  { %v1626_v51 = vpop.f32.mrb[19].mxu0  ;;  %5963 = vmatprep.subr.bf16.mxu1 %v6391_v24 }
 0x149   :  { %5595 = vmatprep.mubr.msk.f32.mxu1 %vm81_vm0, %v1626_v51 }
 0x14a   :  { %5596 = vmatmul.mubr.msk.f32.vlgmr.msra.gmra.mrb[18].mxu1 %vm81_vm0, %v5590_v50 }
 0x14b   :  { %v5604_v52 = vpop.f32.mrb[20].mxu0  ;;  %5965 = vmatpush3.bf16.msra.mxu1 %v6391_v24 }
 0x14c   :  { %v1819_v53 = vpop.f32.mrb[21].mxu0  ;;  %5971 = vmatprep.subr.bf16.mxu1 %v6391_v24 }
 0x14d   :  { %5609 = vmatprep.mubr.msk.f32.mxu1 %vm81_vm0, %v1819_v53 }
 0x14e   :  { %5610 = vmatmul.mubr.msk.f32.vlgmr.msra.gmra.mrb[20].mxu1 %vm81_vm0, %v5604_v52 }
 0x14f   :  { %v5618_v54 = vpop.f32.mrb[22].mxu0  ;;  %5973 = vmatpush3.bf16.msra.mxu1 %v6391_v24 }
 0x150   :  { %v1975_v55 = vpop.f32.mrb[23].mxu0  ;;  %5979 = vmatprep.subr.bf16.mxu1 %v6391_v24 }
 0x151   :  { %5623 = vmatprep.mubr.msk.f32.mxu1 %vm81_vm0, %v1975_v55 }
 0x152   :  { %5624 = vmatmul.mubr.msk.f32.vlgmr.msra.gmra.mrb[22].mxu1 %vm81_vm0, %v5618_v54 }
 0x153   :  { %v5632_v56 = vpop.f32.mrb[24].mxu0  ;;  %5981 = vmatpush3.bf16.msra.mxu1 %v6391_v24 }
 0x154   :  { %v2139_v57 = vpop.f32.mrb[25].mxu0  ;;  %5987 = vmatprep.subr.bf16.mxu1 %v6391_v24 }
 0x155   :  { %5637 = vmatprep.mubr.msk.f32.mxu1 %vm81_vm0, %v2139_v57 }
 0x156   :  { %5638 = vmatmul.mubr.msk.f32.vlgmr.msra.gmra.mrb[24].mxu1 %vm81_vm0, %v5632_v56 }
 0x157   :  { %v5646_v58 = vpop.f32.mrb[26].mxu0  ;;  %5989 = vmatpush3.bf16.msra.mxu1 %v6391_v24 }
 0x158   :  { %v2299_v59 = vpop.f32.mrb[27].mxu0  ;;  %5995 = vmatprep.subr.bf16.mxu1 %v6391_v24 }
 0x159   :  { %5651 = vmatprep.mubr.msk.f32.mxu1 %vm81_vm0, %v2299_v59 }
 0x15a   :  { %5652 = vmatmul.mubr.msk.f32.vlgmr.msra.gmra.mrb[26].mxu1 %vm81_vm0, %v5646_v58 }
 0x15b   :  { %v5660_v60 = vpop.f32.mrb[28].mxu0  ;;  %5997 = vmatpush3.bf16.msra.mxu1 %v6391_v24 }
 0x15c   :  { %v2459_v61 = vpop.f32.mrb[29].mxu0  ;;  %6003 = vmatprep.subr.bf16.mxu1 %v6391_v24 }
 0x15d   :  { %5665 = vmatprep.mubr.msk.f32.mxu1 %vm81_vm0, %v2459_v61 }
 0x15e   :  { %5666 = vmatmul.mubr.msk.f32.vlgmr.msra.gmra.mrb[28].mxu1 %vm81_vm0, %v5660_v60 }
 0x15f   :  { %v5674_v62 = vpop.f32.mrb[30].mxu0  ;;  %6005 = vmatpush3.bf16.msra.mxu1 %v6391_v24 }
 0x160   :  { %v2652_v63 = vpop.f32.mrb[31].mxu0  ;;  %6011 = vmatprep.subr.bf16.mxu1 %v6391_v24 }
 0x161   :  { %5679 = vmatprep.mubr.msk.f32.mxu1 %vm81_vm0, %v2652_v63 }
 0x162   :  { %5680 = vmatmul.mubr.msk.f32.vlgmr.msra.gmra.mrb[30].mxu1 %vm81_vm0, %v5674_v62 }
 0x163   :  { %v5688_v0 = vpop.f32.mrb[32].mxu0  ;;  %6013 = vmatpush3.bf16.msra.mxu1 %v6391_v24 }
 0x164   :  { %v2808_v1 = vpop.f32.mrb[33].mxu0  ;;  %6019 = vmatprep.subr.bf16.mxu1 %v6391_v24 }
 0x165   :  { %5693 = vmatprep.mubr.msk.f32.mxu1 %vm81_vm0, %v2808_v1 }
 0x166   :  { %5694 = vmatmul.mubr.msk.f32.vlgmr.msra.gmra.mrb[32].mxu1 %vm81_vm0, %v5688_v0 }
 0x167   :  { %v5702_v3 = vpop.f32.mrb[34].mxu0  ;;  %6021 = vmatpush3.bf16.msra.mxu1 %v6391_v24 }
 0x168   :  { %v2972_v4 = vpop.f32.mrb[35].mxu0  ;;  %6027 = vmatprep.subr.bf16.mxu1 %v6391_v24 }
 0x169   :  { %5707 = vmatprep.mubr.msk.f32.mxu1 %vm81_vm0, %v2972_v4 }
 0x16a   :  { %5708 = vmatmul.mubr.msk.f32.vlgmr.msra.gmra.mrb[34].mxu1 %vm81_vm0, %v5702_v3 }
 0x16b   :  { %v5716_v5 = vpop.f32.mrb[36].mxu0  ;;  %6029 = vmatpush3.bf16.msra.mxu1 %v6391_v24 }
 0x16c   :  { %v3132_v6 = vpop.f32.mrb[37].mxu0  ;;  %6035 = vmatprep.subr.bf16.mxu1 %v6391_v24 }
 0x16d   :  { %5721 = vmatprep.mubr.msk.f32.mxu1 %vm81_vm0, %v3132_v6 }
 0x16e   :  { %5722 = vmatmul.mubr.msk.f32.vlgmr.msra.gmra.mrb[36].mxu1 %vm81_vm0, %v5716_v5 }
 0x16f   :  { %v5730_v7 = vpop.f32.mrb[38].mxu0  ;;  %6037 = vmatpush3.bf16.msra.mxu1 %v6391_v24 }
 0x170   :  { %v3292_v8 = vpop.f32.mrb[39].mxu0  ;;  %6043 = vmatprep.subr.bf16.mxu1 %v6391_v24 }
 0x171   :  { %5735 = vmatprep.mubr.msk.f32.mxu1 %vm81_vm0, %v3292_v8 }
 0x172   :  { %5736 = vmatmul.mubr.msk.f32.vlgmr.msra.gmra.mrb[38].mxu1 %vm81_vm0, %v5730_v7 }
 0x173   :  { %v5744_v10 = vpop.f32.mrb[40].mxu0  ;;  %6045 = vmatpush3.bf16.msra.mxu1 %v6391_v24 }
 0x174   :  { %v3485_v11 = vpop.f32.mrb[41].mxu0  ;;  %6051 = vmatprep.subr.bf16.mxu1 %v6391_v24 }
 0x175   :  { %5749 = vmatprep.mubr.msk.f32.mxu1 %vm81_vm0, %v3485_v11 }
 0x176   :  { %5750 = vmatmul.mubr.msk.f32.vlgmr.msra.gmra.mrb[40].mxu1 %vm81_vm0, %v5744_v10 }
 0x177   :  { %v5758_v12 = vpop.f32.mrb[42].mxu0  ;;  %6053 = vmatpush3.bf16.msra.mxu1 %v6391_v24 }
 0x178   :  { %v3641_v13 = vpop.f32.mrb[43].mxu0  ;;  %6059 = vmatprep.subr.bf16.mxu1 %v6391_v24 }
 0x179   :  { %5763 = vmatprep.mubr.msk.f32.mxu1 %vm81_vm0, %v3641_v13 }
 0x17a   :  { %5764 = vmatmul.mubr.msk.f32.vlgmr.msra.gmra.mrb[42].mxu1 %vm81_vm0, %v5758_v12 }
 0x17b   :  { %v5772_v14 = vpop.f32.mrb[44].mxu0  ;;  %6061 = vmatpush3.bf16.msra.mxu1 %v6391_v24 }
 0x17c   :  { %v3805_v15 = vpop.f32.mrb[45].mxu0  ;;  %6067 = vmatprep.subr.bf16.mxu1 %v6391_v24 }
 0x17d   :  { %5777 = vmatprep.mubr.msk.f32.mxu1 %vm81_vm0, %v3805_v15 }
 0x17e   :  { %5778 = vmatmul.mubr.msk.f32.vlgmr.msra.gmra.mrb[44].mxu1 %vm81_vm0, %v5772_v14 }
 0x17f   :  { %v5786_v16 = vpop.f32.mrb[46].mxu0  ;;  %6069 = vmatpush3.bf16.msra.mxu1 %v6391_v24 }
 0x180   :  { %v3965_v17 = vpop.f32.mrb[47].mxu0  ;;  %6075 = vmatprep.subr.bf16.mxu1 %v6391_v24 }
 0x181   :  { %5791 = vmatprep.mubr.msk.f32.mxu1 %vm81_vm0, %v3965_v17 }
 0x182   :  { %5792 = vmatmul.mubr.msk.f32.vlgmr.msra.gmra.mrb[46].mxu1 %vm81_vm0, %v5786_v16 }
 0x183   :  { %v5800_v18 = vpop.f32.mrb[48].mxu0  ;;  %6077 = vmatpush3.bf16.msra.mxu1 %v6391_v24 }
 0x184   :  { %v4125_v19 = vpop.f32.mrb[49].mxu0  ;;  %6083 = vmatprep.subr.bf16.mxu1 %v6391_v24 }
 0x185   :  { %5805 = vmatprep.mubr.msk.f32.mxu1 %vm81_vm0, %v4125_v19 }
 0x186   :  { %5806 = vmatmul.mubr.msk.f32.vlgmr.msra.gmra.mrb[48].mxu1 %vm81_vm0, %v5800_v18 }
 0x187   :  { %v5814_v20 = vpop.f32.mrb[50].mxu0  ;;  %6085 = vmatpush3.bf16.msra.mxu1 %v6391_v24 }
 0x188   :  { %v4318_v21 = vpop.f32.mrb[51].mxu0  ;;  %6091 = vmatprep.subr.bf16.mxu1 %v6391_v24 }
 0x189   :  { %5819 = vmatprep.mubr.msk.f32.mxu1 %vm81_vm0, %v4318_v21 }
 0x18a   :  { %5820 = vmatmul.mubr.msk.f32.vlgmr.msra.gmra.mrb[50].mxu1 %vm81_vm0, %v5814_v20 }
 0x18b   :  { %v5828_v22 = vpop.f32.mrb[52].mxu0  ;;  %6093 = vmatpush3.bf16.msra.mxu1 %v6391_v24 }
 0x18c   :  { %v4474_v23 = vpop.f32.mrb[53].mxu0  ;;  %6099 = vmatprep.subr.bf16.mxu1 %v6391_v24 }
 0x18d   :  { %5833 = vmatprep.mubr.msk.f32.mxu1 %vm81_vm0, %v4474_v23 }
 0x18e   :  { %5834 = vmatmul.mubr.msk.f32.vlgmr.msra.gmra.mrb[52].mxu1 %vm81_vm0, %v5828_v22 }
 0x18f   :  { %v5842_v25 = vpop.f32.mrb[54].mxu0  ;;  %6101 = vmatpush3.bf16.msra.mxu1 %v6391_v24 }
 0x190   :  { %v4638_v26 = vpop.f32.mrb[55].mxu0  ;;  %6107 = vmatprep.subr.bf16.mxu1 %v6391_v24 }
 0x191   :  { %5847 = vmatprep.mubr.msk.f32.mxu1 %vm81_vm0, %v4638_v26 }
 0x192   :  { %5848 = vmatmul.mubr.msk.f32.vlgmr.msra.gmra.mrb[54].mxu1 %vm81_vm0, %v5842_v25 }
 0x193   :  { %v5856_v27 = vpop.f32.mrb[56].mxu0  ;;  %6109 = vmatpush3.bf16.msra.mxu1 %v6391_v24 }
 0x194   :  { %v4798_v28 = vpop.f32.mrb[57].mxu0  ;;  %6115 = vmatprep.subr.bf16.mxu1 %v6391_v24 }
 0x195   :  { %5861 = vmatprep.mubr.msk.f32.mxu1 %vm81_vm0, %v4798_v28 }
 0x196   :  { %5862 = vmatmul.mubr.msk.f32.vlgmr.msra.gmra.mrb[56].mxu1 %vm81_vm0, %v5856_v27 }
 0x197   :  { %v5870_v29 = vpop.f32.mrb[58].mxu0  ;;  %6117 = vmatpush3.bf16.msra.mxu1 %v6391_v24 }
 0x198   :  { %v4958_v30 = vpop.f32.mrb[59].mxu0 }
 0x199   :  { %5875 = vmatprep.mubr.msk.f32.mxu1 %vm81_vm0, %v4958_v30 }
 0x19a   :  { %5876 = vmatmul.mubr.msk.f32.vlgmr.msra.gmra.mrb[58].mxu1 %vm81_vm0, %v5870_v29 }
 0x1f9   :  { %v5471_v31 = vpop.f32.mrb[0].mxu1 }
 0x1fa   :  { %v235_v32 = vpop.f32.mrb[1].mxu1  ;;  %v401_v34 = vmul.f32 %v5471_v31, %v5471_v31 }
 0x1fb   :  { %v400_v2 = vmul.f32 %v235_v32, %v235_v32 }
 0x1fd   :  { %v5485_v33 = vpop.f32.mrb[2].mxu1 }
 0x1fe   :  { %v403_v35 = vmul.f32 %v5485_v33, %v5485_v33  ;;  %v405_v36 = vmul.f32 %v5485_v33, %v5471_v31  ;;  %v391_v37 = vpop.f32.mrb[3].mxu1 }
 0x1ff   :  { %v402_v9 = vmul.f32 %v391_v37, %v391_v37  ;;  %v404_v38 = vmul.f32 %v391_v37, %v235_v32 }
 0x200   :  { %v901_v39 = vadd.f32 %v403_v35, %v401_v34  ;;  %v895_v51 = vmul.f32 2.0, %v405_v36 }
 0x201   :  { %v900_v40 = vadd.f32 %v402_v9, %v400_v2  ;;  %v5499_v41 = vpop.f32.mrb[4].mxu1  ;;  %v894_v56 = vmul.f32 2.0, %v404_v38 }
 0x202   :  { %v565_v42 = vsub.f32 %v5499_v41, %v401_v34  ;;  %v555_v24 = vpop.f32.mrb[5].mxu1  ;;  %v903_v52 = vadd.f32 6.5025, %v901_v39  ;;  %v897_v1 = vadd.f32 6.5025, %v895_v51 }
 0x203   :  { %v564_v43 = vsub.f32 %v555_v24, %v400_v2  ;;  %v902_v57 = vadd.f32 6.5025, %v900_v40  ;;  %v896_v5 = vadd.f32 6.5025, %v894_v56 }
 0x205   :  { %v5513_v44 = vpop.f32.mrb[6].mxu1 }
 0x206   :  { %v725_v45 = vsub.f32 %v5513_v44, %v403_v35  ;;  %v715_v46 = vpop.f32.mrb[7].mxu1 }
 0x207   :  { %v724_v47 = vsub.f32 %v715_v46, %v402_v9 }
 0x208   :  { %v891_v48 = vadd.f32 %v725_v45, %v565_v42 }
 0x209   :  { %v890_v49 = vadd.f32 %v724_v47, %v564_v43  ;;  %v5527_v50 = vpop.f32.mrb[8].mxu1 }
 0x20a   :  { %v893_v53 = vadd.f32 58.5225, %v891_v48  ;;  %v885_v54 = vsub.f32 %v5527_v50, %v405_v36  ;;  %v875_v55 = vpop.f32.mrb[9].mxu1 }
 0x20b   :  { %v892_v58 = vadd.f32 58.5225, %v890_v49  ;;  %v884_v59 = vsub.f32 %v875_v55, %v404_v38 }
 0x20c   :  { %v905_v60 = vmul.f32 %v903_v52, %v893_v53  ;;  %v887_v61 = vmul.f32 2.0, %v885_v54 }
 0x20d   :  { %v904_v62 = vmul.f32 %v902_v57, %v892_v58  ;;  %v886_v63 = vmul.f32 2.0, %v884_v59  ;;  %v5541_v0 = vpop.f32.mrb[10].mxu1 }
 0x20e   :  { %6125 = vrcp.f32 %v905_v60  ;;  %v889_v3 = vadd.f32 58.5225, %v887_v61  ;;  %v1067_v4 = vpop.f32.mrb[11].mxu1  ;;  %v1233_v11 = vmul.f32 %v5541_v0, %v5541_v0 }
 0x20f   :  { %6127 = vrcp.f32 %v904_v62  ;;  %v888_v6 = vadd.f32 58.5225, %v886_v63  ;;  %v1232_v15 = vmul.f32 %v1067_v4, %v1067_v4 }
 0x210   :  { %v899_v7 = vmul.f32 %v897_v1, %v889_v3 }
 0x211   :  { %v898_v8 = vmul.f32 %v896_v5, %v888_v6  ;;  %v5555_v10 = vpop.f32.mrb[12].mxu1 }
 0x212   :  { %v1235_v12 = vmul.f32 %v5555_v10, %v5555_v10  ;;  %v1237_v13 = vmul.f32 %v5555_v10, %v5541_v0  ;;  %v1223_v14 = vpop.f32.mrb[13].mxu1 }
 0x213   :  { %v1234_v16 = vmul.f32 %v1223_v14, %v1223_v14  ;;  %v1236_v17 = vmul.f32 %v1223_v14, %v1067_v4 }
 0x214   :  { %v1733_v18 = vadd.f32 %v1235_v12, %v1233_v11  ;;  %v1727_v2 = vmul.f32 2.0, %v1237_v13 }
 0x215   :  { %v1732_v19 = vadd.f32 %v1234_v16, %v1232_v15  ;;  %v5569_v20 = vpop.f32.mrb[14].mxu1  ;;  %v1726_v41 = vmul.f32 2.0, %v1236_v17 }
 0x216   :  { %v1397_v21 = vsub.f32 %v5569_v20, %v1233_v11  ;;  %v1387_v22 = vpop.f32.mrb[15].mxu1  ;;  %v1735_v9 = vadd.f32 6.5025, %v1733_v18  ;;  %v1729_v49 = vadd.f32 6.5025, %v1727_v2 }
 0x217   :  { %v1396_v23 = vsub.f32 %v1387_v22, %v1232_v15  ;;  %v1734_v42 = vadd.f32 6.5025, %v1732_v19  ;;  %v1728_v52 = vadd.f32 6.5025, %v1726_v41 }
 0x218   :  { %v6126_v25 = vpop.eup %6125 }
 0x219   :  { %v6128_v26 = vpop.eup %6127  ;;  %v909_v27 = vmul.f32 %v6126_v25, %v899_v7  ;;  %v5583_v28 = vpop.f32.mrb[16].mxu1 }
 0x21a   :  { %v907_v29 = vmul.f32 %v6128_v26, %v898_v8  ;;  %v1557_v30 = vsub.f32 %v5583_v28, %v1235_v12  ;;  %v1547_v31 = vpop.f32.mrb[17].mxu1 }
 0x21b   :  { %v911_v32 = vsub.f32 1.0, %v909_v27  ;;  %v1556_v33 = vsub.f32 %v1547_v31, %v1234_v16 }
 0x21c   :  { %v910_v34 = vsub.f32 1.0, %v907_v29  ;;  %v1723_v35 = vadd.f32 %v1557_v30, %v1397_v21 }
 0x21d   :  { %913 = vst.msk [vmem:[#allocation10 + $0x8] sm:$0xff] %vm81_vm0, %v911_v32  ;;  %v1722_v36 = vadd.f32 %v1556_v33, %v1396_v23  ;;  %v5597_v37 = vpop.f32.mrb[18].mxu1 }
 0x21e   :  { %912 = vst.msk [vmem:[#allocation10] sm:$0xff] %vm81_vm0, %v910_v34  ;;  %v1725_v38 = vadd.f32 58.5225, %v1723_v35  ;;  %v1717_v39 = vsub.f32 %v5597_v37, %v1237_v13  ;;  %v1707_v40 = vpop.f32.mrb[19].mxu1 }
 0x21f   :  { %v1724_v24 = vadd.f32 58.5225, %v1722_v36  ;;  %v1716_v43 = vsub.f32 %v1707_v40, %v1236_v17 }
 0x220   :  { %v1737_v44 = vmul.f32 %v1735_v9, %v1725_v38  ;;  %v1719_v45 = vmul.f32 2.0, %v1717_v39 }
 0x221   :  { %v1736_v46 = vmul.f32 %v1734_v42, %v1724_v24  ;;  %v1718_v47 = vmul.f32 2.0, %v1716_v43  ;;  %v5611_v48 = vpop.f32.mrb[20].mxu1 }
 0x222   :  { %6129 = vrcp.f32 %v1737_v44  ;;  %v1721_v50 = vadd.f32 58.5225, %v1719_v45  ;;  %v1900_v51 = vpop.f32.mrb[21].mxu1  ;;  %v2066_v57 = vmul.f32 %v5611_v48, %v5611_v48 }
 0x223   :  { %6131 = vrcp.f32 %v1736_v46  ;;  %v1720_v53 = vadd.f32 58.5225, %v1718_v47  ;;  %v2065_v61 = vmul.f32 %v1900_v51, %v1900_v51 }
 0x224   :  { %v1731_v54 = vmul.f32 %v1729_v49, %v1721_v50 }
 0x225   :  { %v1730_v55 = vmul.f32 %v1728_v52, %v1720_v53  ;;  %v5625_v56 = vpop.f32.mrb[22].mxu1 }
 0x226   :  { %v2068_v58 = vmul.f32 %v5625_v56, %v5625_v56  ;;  %v2070_v59 = vmul.f32 %v5625_v56, %v5611_v48  ;;  %v2056_v60 = vpop.f32.mrb[23].mxu1 }
 0x227   :  { %v2067_v62 = vmul.f32 %v2056_v60, %v2056_v60  ;;  %v2069_v63 = vmul.f32 %v2056_v60, %v1900_v51 }
 0x228   :  { %v2566_v0 = vadd.f32 %v2068_v58, %v2066_v57  ;;  %v2560_v21 = vmul.f32 2.0, %v2070_v59 }
 0x229   :  { %v2565_v1 = vadd.f32 %v2067_v62, %v2065_v61  ;;  %v5639_v3 = vpop.f32.mrb[24].mxu1  ;;  %v2559_v27 = vmul.f32 2.0, %v2069_v63 }
 0x22a   :  { %v2230_v4 = vsub.f32 %v5639_v3, %v2066_v57  ;;  %v2220_v5 = vpop.f32.mrb[25].mxu1  ;;  %v2568_v22 = vadd.f32 6.5025, %v2566_v0  ;;  %v2562_v36 = vadd.f32 6.5025, %v2560_v21 }
 0x22b   :  { %v2229_v6 = vsub.f32 %v2220_v5, %v2065_v61  ;;  %v2567_v28 = vadd.f32 6.5025, %v2565_v1  ;;  %v2561_v9 = vadd.f32 6.5025, %v2559_v27 }
 0x22c   :  { %v6130_v7 = vpop.eup %6129 }
 0x22d   :  { %v6132_v8 = vpop.eup %6131  ;;  %v1741_v10 = vmul.f32 %v6130_v7, %v1731_v54  ;;  %v5653_v11 = vpop.f32.mrb[26].mxu1 }
 0x22e   :  { %v1739_v12 = vmul.f32 %v6132_v8, %v1730_v55  ;;  %v2390_v13 = vsub.f32 %v5653_v11, %v2068_v58  ;;  %v2380_v14 = vpop.f32.mrb[27].mxu1 }
 0x22f   :  { %v1743_v15 = vsub.f32 1.0, %v1741_v10  ;;  %v2389_v16 = vsub.f32 %v2380_v14, %v2067_v62 }
 0x230   :  { %v1742_v17 = vsub.f32 1.0, %v1739_v12  ;;  %v2556_v18 = vadd.f32 %v2390_v13, %v2230_v4 }
 0x231   :  { %1746 = vst.msk [vmem:[#allocation10 + $0x18] sm:$0xff] %vm81_vm0, %v1743_v15  ;;  %v2555_v19 = vadd.f32 %v2389_v16, %v2229_v6  ;;  %v5667_v20 = vpop.f32.mrb[28].mxu1 }
 0x232   :  { %1745 = vst.msk [vmem:[#allocation10 + $0x10] sm:$0xff] %vm81_vm0, %v1742_v17  ;;  %v2558_v23 = vadd.f32 58.5225, %v2556_v18  ;;  %v2550_v25 = vsub.f32 %v5667_v20, %v2070_v59  ;;  %v2540_v26 = vpop.f32.mrb[29].mxu1 }
 0x233   :  { %v2557_v29 = vadd.f32 58.5225, %v2555_v19  ;;  %v2549_v30 = vsub.f32 %v2540_v26, %v2069_v63 }
 0x234   :  { %v2570_v31 = vmul.f32 %v2568_v22, %v2558_v23  ;;  %v2552_v32 = vmul.f32 2.0, %v2550_v25 }
 0x235   :  { %v2569_v33 = vmul.f32 %v2567_v28, %v2557_v29  ;;  %v2551_v34 = vmul.f32 2.0, %v2549_v30  ;;  %v5681_v35 = vpop.f32.mrb[30].mxu1 }
 0x236   :  { %6133 = vrcp.f32 %v2570_v31  ;;  %v2554_v37 = vadd.f32 58.5225, %v2552_v32  ;;  %v2733_v2 = vpop.f32.mrb[31].mxu1  ;;  %v2899_v42 = vmul.f32 %v5681_v35, %v5681_v35 }
 0x237   :  { %6135 = vrcp.f32 %v2569_v33  ;;  %v2553_v38 = vadd.f32 58.5225, %v2551_v34  ;;  %v2898_v45 = vmul.f32 %v2733_v2, %v2733_v2 }
 0x238   :  { %v2564_v39 = vmul.f32 %v2562_v36, %v2554_v37 }
 0x239   :  { %v2563_v40 = vmul.f32 %v2561_v9, %v2553_v38  ;;  %v5695_v41 = vpop.f32.mrb[32].mxu1 }
 0x23a   :  { %v2901_v24 = vmul.f32 %v5695_v41, %v5695_v41  ;;  %v2903_v43 = vmul.f32 %v5695_v41, %v5681_v35  ;;  %v2889_v44 = vpop.f32.mrb[33].mxu1 }
 0x23b   :  { %v2900_v46 = vmul.f32 %v2889_v44, %v2889_v44  ;;  %v2902_v47 = vmul.f32 %v2889_v44, %v2733_v2 }
 0x23c   :  { %v3399_v48 = vadd.f32 %v2901_v24, %v2899_v42  ;;  %v3393_v4 = vmul.f32 2.0, %v2903_v43 }
 0x23d   :  { %v3398_v49 = vadd.f32 %v2900_v46, %v2898_v45  ;;  %v5709_v50 = vpop.f32.mrb[34].mxu1  ;;  %v3392_v10 = vmul.f32 2.0, %v2902_v47 }
 0x23e   :  { %v3063_v51 = vsub.f32 %v5709_v50, %v2899_v42  ;;  %v3053_v52 = vpop.f32.mrb[35].mxu1  ;;  %v3401_v5 = vadd.f32 6.5025, %v3399_v48  ;;  %v3395_v19 = vadd.f32 6.5025, %v3393_v4 }
 0x23f   :  { %v3062_v53 = vsub.f32 %v3053_v52, %v2898_v45  ;;  %v3400_v11 = vadd.f32 6.5025, %v3398_v49  ;;  %v3394_v22 = vadd.f32 6.5025, %v3392_v10 }
 0x240   :  { %v6134_v54 = vpop.eup %6133 }
 0x241   :  { %v6136_v55 = vpop.eup %6135  ;;  %v2574_v56 = vmul.f32 %v6134_v54, %v2564_v39  ;;  %v5723_v57 = vpop.f32.mrb[36].mxu1 }
 0x242   :  { %v2572_v58 = vmul.f32 %v6136_v55, %v2563_v40  ;;  %v3223_v59 = vsub.f32 %v5723_v57, %v2901_v24  ;;  %v3213_v60 = vpop.f32.mrb[37].mxu1 }
 0x243   :  { %v2576_v61 = vsub.f32 1.0, %v2574_v56  ;;  %v3222_v62 = vsub.f32 %v3213_v60, %v2900_v46 }
 0x244   :  { %v2575_v63 = vsub.f32 1.0, %v2572_v58  ;;  %v3389_v0 = vadd.f32 %v3223_v59, %v3063_v51 }
 0x245   :  { %2579 = vst.msk [vmem:[#allocation10 + $0x28] sm:$0xff] %vm81_vm0, %v2576_v61  ;;  %v3388_v1 = vadd.f32 %v3222_v62, %v3062_v53  ;;  %v5737_v3 = vpop.f32.mrb[38].mxu1 }
 0x246   :  { %2578 = vst.msk [vmem:[#allocation10 + $0x20] sm:$0xff] %vm81_vm0, %v2575_v63  ;;  %v3391_v6 = vadd.f32 58.5225, %v3389_v0  ;;  %v3383_v7 = vsub.f32 %v5737_v3, %v2903_v43  ;;  %v3373_v8 = vpop.f32.mrb[39].mxu1 }
 0x247   :  { %v3390_v12 = vadd.f32 58.5225, %v3388_v1  ;;  %v3382_v13 = vsub.f32 %v3373_v8, %v2902_v47 }
 0x248   :  { %v3403_v14 = vmul.f32 %v3401_v5, %v3391_v6  ;;  %v3385_v15 = vmul.f32 2.0, %v3383_v7 }
 0x249   :  { %v3402_v16 = vmul.f32 %v3400_v11, %v3390_v12  ;;  %v3384_v17 = vmul.f32 2.0, %v3382_v13  ;;  %v5751_v18 = vpop.f32.mrb[40].mxu1 }
 0x24a   :  { %6137 = vrcp.f32 %v3403_v14  ;;  %v3387_v20 = vadd.f32 58.5225, %v3385_v15  ;;  %v3566_v21 = vpop.f32.mrb[41].mxu1  ;;  %v3732_v28 = vmul.f32 %v5751_v18, %v5751_v18 }
 0x24b   :  { %6139 = vrcp.f32 %v3402_v16  ;;  %v3386_v23 = vadd.f32 58.5225, %v3384_v17  ;;  %v3731_v32 = vmul.f32 %v3566_v21, %v3566_v21 }
 0x24c   :  { %v3397_v25 = vmul.f32 %v3395_v19, %v3387_v20 }
 0x24d   :  { %v3396_v26 = vmul.f32 %v3394_v22, %v3386_v23  ;;  %v5765_v27 = vpop.f32.mrb[42].mxu1 }
 0x24e   :  { %v3734_v29 = vmul.f32 %v5765_v27, %v5765_v27  ;;  %v3736_v30 = vmul.f32 %v5765_v27, %v5751_v18  ;;  %v3722_v31 = vpop.f32.mrb[43].mxu1 }
 0x24f   :  { %v3733_v33 = vmul.f32 %v3722_v31, %v3722_v31  ;;  %v3735_v34 = vmul.f32 %v3722_v31, %v3566_v21 }
 0x250   :  { %v4232_v35 = vadd.f32 %v3734_v29, %v3732_v28  ;;  %v4226_v51 = vmul.f32 2.0, %v3736_v30 }
 0x251   :  { %v4231_v36 = vadd.f32 %v3733_v33, %v3731_v32  ;;  %v5779_v37 = vpop.f32.mrb[44].mxu1  ;;  %v4225_v56 = vmul.f32 2.0, %v3735_v34 }
 0x252   :  { %v3896_v2 = vsub.f32 %v5779_v37, %v3732_v28  ;;  %v3886_v9 = vpop.f32.mrb[45].mxu1  ;;  %v4234_v52 = vadd.f32 6.5025, %v4232_v35  ;;  %v4228_v1 = vadd.f32 6.5025, %v4226_v51 }
 0x253   :  { %v3895_v38 = vsub.f32 %v3886_v9, %v3731_v32  ;;  %v4233_v57 = vadd.f32 6.5025, %v4231_v36  ;;  %v4227_v5 = vadd.f32 6.5025, %v4225_v56 }
 0x254   :  { %v6138_v39 = vpop.eup %6137 }
 0x255   :  { %v6140_v40 = vpop.eup %6139  ;;  %v3407_v41 = vmul.f32 %v6138_v39, %v3397_v25  ;;  %v5793_v42 = vpop.f32.mrb[46].mxu1 }
 0x256   :  { %v3405_v24 = vmul.f32 %v6140_v40, %v3396_v26  ;;  %v4056_v43 = vsub.f32 %v5793_v42, %v3734_v29  ;;  %v4046_v44 = vpop.f32.mrb[47].mxu1 }
 0x257   :  { %v3409_v45 = vsub.f32 1.0, %v3407_v41  ;;  %v4055_v46 = vsub.f32 %v4046_v44, %v3733_v33 }
 0x258   :  { %v3408_v47 = vsub.f32 1.0, %v3405_v24  ;;  %v4222_v48 = vadd.f32 %v4056_v43, %v3896_v2 }
 0x259   :  { %3412 = vst.msk [vmem:[#allocation10 + $0x38] sm:$0xff] %vm81_vm0, %v3409_v45  ;;  %v4221_v49 = vadd.f32 %v4055_v46, %v3895_v38  ;;  %v5807_v50 = vpop.f32.mrb[48].mxu1 }
 0x25a   :  { %3411 = vst.msk [vmem:[#allocation10 + $0x30] sm:$0xff] %vm81_vm0, %v3408_v47  ;;  %v4224_v53 = vadd.f32 58.5225, %v4222_v48  ;;  %v4216_v54 = vsub.f32 %v5807_v50, %v3736_v30  ;;  %v4206_v55 = vpop.f32.mrb[49].mxu1 }
 0x25b   :  { %v4223_v58 = vadd.f32 58.5225, %v4221_v49  ;;  %v4215_v59 = vsub.f32 %v4206_v55, %v3735_v34 }
 0x25c   :  { %v4236_v60 = vmul.f32 %v4234_v52, %v4224_v53  ;;  %v4218_v61 = vmul.f32 2.0, %v4216_v54 }
 0x25d   :  { %v4235_v62 = vmul.f32 %v4233_v57, %v4223_v58  ;;  %v4217_v63 = vmul.f32 2.0, %v4215_v59  ;;  %v5821_v0 = vpop.f32.mrb[50].mxu1 }
 0x25e   :  { %6141 = vrcp.f32 %v4236_v60  ;;  %v4220_v3 = vadd.f32 58.5225, %v4218_v61  ;;  %v4399_v4 = vpop.f32.mrb[51].mxu1  ;;  %v4565_v11 = vmul.f32 %v5821_v0, %v5821_v0 }
 0x25f   :  { %6143 = vrcp.f32 %v4235_v62  ;;  %v4219_v6 = vadd.f32 58.5225, %v4217_v63  ;;  %v4564_v15 = vmul.f32 %v4399_v4, %v4399_v4 }
 0x260   :  { %v4230_v7 = vmul.f32 %v4228_v1, %v4220_v3 }
 0x261   :  { %v4229_v8 = vmul.f32 %v4227_v5, %v4219_v6  ;;  %v5835_v10 = vpop.f32.mrb[52].mxu1 }
 0x262   :  { %v4567_v12 = vmul.f32 %v5835_v10, %v5835_v10  ;;  %v4569_v13 = vmul.f32 %v5835_v10, %v5821_v0  ;;  %v4555_v14 = vpop.f32.mrb[53].mxu1 }
 0x263   :  { %v4566_v16 = vmul.f32 %v4555_v14, %v4555_v14  ;;  %v4568_v17 = vmul.f32 %v4555_v14, %v4399_v4 }
 0x264   :  { %v5065_v18 = vadd.f32 %v4567_v12, %v4565_v11  ;;  %v5059_v2 = vmul.f32 2.0, %v4569_v13 }
 0x265   :  { %v5064_v19 = vadd.f32 %v4566_v16, %v4564_v15  ;;  %v5849_v20 = vpop.f32.mrb[54].mxu1  ;;  %v5058_v41 = vmul.f32 2.0, %v4568_v17 }
 0x266   :  { %v4729_v21 = vsub.f32 %v5849_v20, %v4565_v11  ;;  %v4719_v22 = vpop.f32.mrb[55].mxu1  ;;  %v5067_v9 = vadd.f32 6.5025, %v5065_v18  ;;  %v5061_v48 = vadd.f32 6.5025, %v5059_v2 }
 0x267   :  { %v4728_v23 = vsub.f32 %v4719_v22, %v4564_v15  ;;  %v5066_v42 = vadd.f32 6.5025, %v5064_v19  ;;  %v5060_v50 = vadd.f32 6.5025, %v5058_v41 }
 0x268   :  { %v6142_v25 = vpop.eup %6141 }
 0x269   :  { %v6144_v26 = vpop.eup %6143  ;;  %v4240_v27 = vmul.f32 %v6142_v25, %v4230_v7  ;;  %v5863_v28 = vpop.f32.mrb[56].mxu1 }
 0x26a   :  { %v4238_v29 = vmul.f32 %v6144_v26, %v4229_v8  ;;  %v4889_v30 = vsub.f32 %v5863_v28, %v4567_v12  ;;  %v4879_v31 = vpop.f32.mrb[57].mxu1 }
 0x26b   :  { %v4242_v32 = vsub.f32 1.0, %v4240_v27  ;;  %v4888_v33 = vsub.f32 %v4879_v31, %v4566_v16 }
 0x26c   :  { %v4241_v34 = vsub.f32 1.0, %v4238_v29  ;;  %v5055_v35 = vadd.f32 %v4889_v30, %v4729_v21 }
 0x26d   :  { %4245 = vst.msk [vmem:[#allocation10 + $0x48] sm:$0xff] %vm81_vm0, %v4242_v32  ;;  %v5054_v36 = vadd.f32 %v4888_v33, %v4728_v23  ;;  %v5877_v37 = vpop.f32.mrb[58].mxu1 }
 0x26e   :  { %4244 = vst.msk [vmem:[#allocation10 + $0x40] sm:$0xff] %vm81_vm0, %v4241_v34  ;;  %v5057_v38 = vadd.f32 58.5225, %v5055_v35  ;;  %v5049_v39 = vsub.f32 %v5877_v37, %v4569_v13  ;;  %v5039_v40 = vpop.f32.mrb[59].mxu1 }
 0x26f   :  { %v5056_v24 = vadd.f32 58.5225, %v5054_v36  ;;  %v5048_v43 = vsub.f32 %v5039_v40, %v4568_v17 }
 0x270   :  { %v5069_v44 = vmul.f32 %v5067_v9, %v5057_v38  ;;  %v5051_v45 = vmul.f32 2.0, %v5049_v39 }
 0x271   :  { %v5068_v46 = vmul.f32 %v5066_v42, %v5056_v24  ;;  %v5050_v47 = vmul.f32 2.0, %v5048_v43 }
 0x272   :  { %6145 = vrcp.f32 %v5069_v44  ;;  %v5053_v49 = vadd.f32 58.5225, %v5051_v45 }
 0x273   :  { %6147 = vrcp.f32 %v5068_v46  ;;  %v5052_v51 = vadd.f32 58.5225, %v5050_v47 }
 0x274   :  { %v5063_v52 = vmul.f32 %v5061_v48, %v5053_v49 }
 0x275   :  { %v5062_v53 = vmul.f32 %v5060_v50, %v5052_v51 }
 0x27c   :  { %v6146_v54 = vpop.eup %6145 }
 0x27d   :  { %v6148_v55 = vpop.eup %6147  ;;  %v5073_v56 = vmul.f32 %v6146_v54, %v5063_v52 }
 0x27e   :  { %v5071_v57 = vmul.f32 %v6148_v55, %v5062_v53 }
 0x27f   :  { %v5075_v58 = vsub.f32 1.0, %v5073_v56 }
 0x280   :  { %v5074_v59 = vsub.f32 1.0, %v5071_v57 }
 0x281   :  { %5078 = vst.msk [vmem:[#allocation10 + $0x58] sm:$0xff] %vm81_vm0, %v5075_v58 }
 0x282   :  { %5077 = vst.msk [vmem:[#allocation10 + $0x50] sm:$0xff] %vm81_vm0, %v5074_v59 }
 0x283   :  { %6248 = shalt.err (!%p6245_p8)
}
 0x284   :  { %s6249_s15 = scalar_lea.hbm %s6650_s4, 1536 }
 0x285   :  { %p6250_p9 = scmp.ne.s32.totalorder %s6650_s4, %s6249_s15  ;;  %p6253_p10 = scmp.lt.u32.totalorder %s6249_s15, %s6650_s4 }
 0x287   :  { %p6255_p11 = pnand %p6253_p10, %p6250_p9 }
 0x289   :  { %6258 = shalt.err (!%p6255_p11)
}
 0x28a   :  { %5090 = dma.vmem_to_hbm [thread:$0]  %s5085_s12, 1536, %s6650_s4, [#allocation4], %s6269_s27, %s6269_s27, %s6270_s28  }
 0x28b   :  { %6265 = dma.done.wait [#allocation4], 1536  }
 0x28c   :  { %6266 = vsyncadd [#allocation4], 4294965760 }
 0x28d   :  { %5094 = vsyncpa [#allocation3], 1 }
 0x28e   :  { %5095 = vsyncpa [#allocation6], 1 }
 0x28f   :  { %5096 = vsyncpa [#allocation9], 1 }
 0x290   :  { %5097 = vsyncpa [#allocation4], 1 }

</bundles_post_ra>
